<compile_context>
chip_gen: v7x
topology: tpu7x:2x2x1
jax: 0.10.0
libtpu: 0.0.40
codegen_flags: <defaults>
</compile_context>

<pallas_src>
import functools
import math

import jax
import jax.numpy as jnp
from jax.experimental import pallas as pl
from jax.experimental.pallas import tpu as pltpu


_LANE = 128                      # TPU lane width: keep channel dims lane-dense.
_VMEM_LIMIT = 48 * 1024 * 1024   # < 64 MiB physical (v7x), > 16/32 MiB defaults.


def _round_up(n, m):
    return ((n + m - 1) // m) * m


def _lcm(a, b):
    return a * b // math.gcd(a, b)


# ----------------------------- Pallas kernels --------------------------------


def _scatter_kernel(blk_start_ref, blk_count_ref,   # scalar prefetch (SMEM)
                    heads_ref, msg_ref,             # tiled inputs (VMEM)
                    agg_ref,                        # tiled output (VMEM, bf16)
                    acc_ref,                        # VMEM f32 accumulator
                    *, node_tile):
    """Segmented scatter-add:  agg[n, :] = sum_{e : head_e == n} msg[e, :].

    Edges are pre-sorted by head node, so node tile `i` only owns the
    contiguous edge blocks [blk_start[i], blk_start[i] + blk_count[i]); the
    grid's second ("arbitrary") axis walks those blocks while a
    (node_tile, C) f32 accumulator stays resident in VMEM.  Within a block the
    scatter is a local one-hot (node_tile, edge_tile) @ (edge_tile, C) matmul
    on the MXU (bf16 operands, f32 accumulation).
    """
    i = pl.program_id(0)
    j = pl.program_id(1)

    @pl.when(j == 0)
    def _init():
        acc_ref[...] = jnp.zeros_like(acc_ref)

    @pl.when(j < blk_count_ref[i])
    def _accumulate():
        edge_tile = heads_ref.shape[-1]
        rows = jax.lax.broadcasted_iota(jnp.int32, (node_tile, edge_tile), 0)
        # bool -> bf16 directly (no f32 select), MXU-ready.
        onehot = (rows + i * node_tile == heads_ref[...]).astype(jnp.bfloat16)
        acc_ref[...] += jnp.dot(onehot, msg_ref[...],
                                preferred_element_type=jnp.float32)

    @pl.when(j == pl.num_programs(1) - 1)
    def _finalize():
        agg_ref[...] = acc_ref[...].astype(agg_ref.dtype)   # bf16 writeback


def _dense_kernel(x_ref, loop_rel_ref, agg_in_ref, agg_out_ref, w_stack_ref,
                  out_ref, lhs_ref):
    """out = tanh(([agg_in | agg_out | x - loop_rel] @ W_stack) / 3).

    Single K = 3*C_in MXU contraction against the stacked weight (fewer MXU
    weight-load/drain transitions than three K=C_in dots).  Subtraction stays
    in f32 (v5e has no bf16 VPU); loop_rel arrives as a (1, C) row.
    """
    c = x_ref.shape[-1]
    lhs_ref[:, 0 * c:1 * c] = agg_in_ref[...]                       # already bf16
    lhs_ref[:, 1 * c:2 * c] = agg_out_ref[...]                      # already bf16
    lhs_ref[:, 2 * c:3 * c] = (x_ref[...] - loop_rel_ref[...]).astype(jnp.bfloat16)
    acc = jnp.dot(lhs_ref[...], w_stack_ref[...],
                  preferred_element_type=jnp.float32)
    # TODO(synk): nn.Dropout(0.2) on the in/out terms is identity (eval mode).
    out_ref[...] = jnp.tanh(acc * (1.0 / 3.0))


# --------------------- graph-static preprocessing (hoisted) -------------------


def _normalization(head, tail, num_nodes):
    edge_weight = jnp.ones(head.shape, dtype=jnp.float32)
    degree = jax.ops.segment_sum(edge_weight, head, num_segments=num_nodes)
    degree_inv = jnp.where(degree > 0.0,
                           jax.lax.rsqrt(jnp.maximum(degree, 1.0)), 0.0)
    return degree_inv[head] * edge_weight * degree_inv[tail]


def _precompute_direction(head, tail, etype, num_nodes,
                          *, n_pad, node_tile, edge_tile):
    """Sort edges by destination node, pad, and build the per-node-tile
    edge-block ranges consumed via scalar prefetch.  Graph-static: computed
    once per graph, not per forward."""
    num_edges = int(head.shape[0])
    e_pad = _round_up(max(num_edges, 1), edge_tile)
    pad = e_pad - num_edges

    norm = _normalization(head, tail, num_nodes)
    order = jnp.argsort(head)
    head_s = jnp.concatenate(
        [head[order].astype(jnp.int32), jnp.full((pad,), n_pad, jnp.int32)])
    tail_s = jnp.concatenate(
        [tail[order].astype(jnp.int32), jnp.zeros((pad,), jnp.int32)])
    type_s = jnp.concatenate(
        [etype[order].astype(jnp.int32), jnp.zeros((pad,), jnp.int32)])
    norm_s = jnp.concatenate(
        [norm[order].astype(jnp.float32), jnp.zeros((pad,), jnp.float32)])

    # Per node-tile contiguous edge-block ranges (valid because edges are
    # sorted by head).  Padding edges (head == n_pad, norm == 0) own no tile.
    n_tiles = n_pad // node_tile
    blk_of_edge = jnp.arange(e_pad, dtype=jnp.int32) // edge_tile
    tile_of_edge = jnp.where(head_s < n_pad, head_s // node_tile,
                             n_tiles).astype(jnp.int32)
    first_blk = jax.ops.segment_min(blk_of_edge, tile_of_edge,
                                    num_segments=n_tiles + 1)[:n_tiles]
    last_blk = jax.ops.segment_max(blk_of_edge, tile_of_edge,
                                   num_segments=n_tiles + 1)[:n_tiles]
    n_in_tile = jax.ops.segment_sum(jnp.ones((e_pad,), jnp.int32), tile_of_edge,
                                    num_segments=n_tiles + 1)[:n_tiles]
    has_edges = n_in_tile > 0
    blk_start = jnp.where(has_edges, first_blk, 0).astype(jnp.int32)
    blk_count = jnp.where(has_edges, last_blk - first_blk + 1, 0).astype(jnp.int32)
    # One-time host sync here (precompute), so forward grids are static.
    max_blocks = max(int(jax.device_get(jnp.max(blk_count))), 1)
    # TODO(synk): for heavily skewed degree distributions, a block-major 1-D
    # grid over edge blocks (prefetched tile_of_block driving the out index_map)
    # removes the max_blocks padding entirely.
    return dict(tail=tail_s, type=type_s, norm=norm_s,
                heads=head_s.reshape(1, e_pad),
                blk_start=blk_start, blk_count=blk_count,
                max_blocks=max_blocks)


def precompute_graph(edge_index, edge_type, num_nodes,
                     *, node_tile=256, edge_tile=512, dense_tile=256):
    """Graph-static structures for compgcn_forward.

    Tile guidance: node_tile=256 / edge_tile=512-1024 on v6e/v7x (256-aligned),
    node_tile=128 / edge_tile=512 on v5e; dense_tile>=256 (512 if VMEM allows).
    No tile halving on v7x — the working set is tiny; ensure n_pad/node_tile>=2
    on v7x so the parallel node axis shards across both TensorCores.
    """
    total_edges = edge_index.shape[1]
    E = total_edges // 2
    n_pad = _round_up(num_nodes, _lcm(node_tile, dense_tile))
    in_index, out_index = edge_index[:, :E], edge_index[:, E:]
    in_type, out_type = edge_type[:E], edge_type[E:]
    return {
        "num_nodes": num_nodes, "n_pad": n_pad,
        "node_tile": node_tile, "edge_tile": edge_tile, "dense_tile": dense_tile,
        "in": _precompute_direction(in_index[0], in_index[1], in_type, num_nodes,
                                    n_pad=n_pad, node_tile=node_tile,
                                    edge_tile=edge_tile),
        "out": _precompute_direction(out_index[0], out_index[1], out_type,
                                     num_nodes, n_pad=n_pad,
                                     node_tile=node_tile, edge_tile=edge_tile),
    }


# ------------------------------ JAX glue --------------------------------------


def _segment_scatter(msg, heads_2d, blk_start, blk_count, max_blocks,
                     *, n_pad, node_tile, edge_tile, c_pad):
    n_tiles = n_pad // node_tile

    def _edge_block(i, j, bs, bc):
        # Masked steps (j >= blk_count[i]) re-use the previous block index so the
        # pipeline skips the re-fetch (no dead HBM traffic on skewed degrees).
        return bs[i] + jnp.minimum(j, jnp.maximum(bc[i] - 1, 0))

    grid_spec = pltpu.PrefetchScalarGridSpec(
        num_scalar_prefetch=2,
        grid=(n_tiles, max_blocks),
        in_specs=[
            pl.BlockSpec((1, edge_tile),
                         lambda i, j, bs, bc: (0, _edge_block(i, j, bs, bc))),
            pl.BlockSpec((edge_tile, c_pad),
                         lambda i, j, bs, bc: (_edge_block(i, j, bs, bc), 0)),
        ],
        out_specs=pl.BlockSpec((node_tile, c_pad), lambda i, j, bs, bc: (i, 0)),
        scratch_shapes=[pltpu.VMEM((node_tile, c_pad), jnp.float32)],
    )
    return pl.pallas_call(
        functools.partial(_scatter_kernel, node_tile=node_tile),
        grid_spec=grid_spec,
        out_shape=jax.ShapeDtypeStruct((n_pad, c_pad), jnp.bfloat16),
        compiler_params=pltpu.CompilerParams(
            dimension_semantics=("parallel", "arbitrary"),
            vmem_limit_bytes=_VMEM_LIMIT),
    )(blk_start, blk_count, heads_2d, msg)


def compgcn_forward(nodes_features, relation_embedding, params, graph):
    """Mirrors CompGcn_non_first_layer.forward (comp_type='sub', 'sum' aggregation).

    `graph` comes from precompute_graph() (static across layers / steps), so
    this function has static grid shapes and no host syncs.
    """
    x = nodes_features.astype(jnp.float32)
    N, C_in = x.shape
    C_out = params["w_in"].shape[1]

    node_tile = graph["node_tile"]
    edge_tile = graph["edge_tile"]
    dense_tile = graph["dense_tile"]
    n_pad = graph["n_pad"]

    c_in_pad = _round_up(C_in, _LANE)
    c_out_pad = _round_up(C_out, _LANE)

    # relation_embedding = cat([relation_embedding, loop_rel], dim=0)
    rel_full = jnp.concatenate(
        [relation_embedding.astype(jnp.float32),
         params["loop_rel"].astype(jnp.float32)], axis=0)

    # Zero-pad channels to lane multiples and nodes to the tile size (exact:
    # padded channels are zero, padded node rows are sliced off at the end).
    x_pad = jnp.pad(x, ((0, n_pad - N), (0, c_in_pad - C_in)))
    rel_pad = jnp.pad(rel_full, ((0, 0), (0, c_in_pad - C_in)))
    loop_rel_pad = rel_pad[-1:]                       # (1, c_in_pad)

    def _pad_w(w):
        return jnp.pad(w.astype(jnp.float32),
                       ((0, c_in_pad - C_in), (0, c_out_pad - C_out)))

    # Stacked (3*C_in, C_out) bf16 weight -> single K=3*C_in MXU pass.
    w_stack = jnp.concatenate(
        [_pad_w(params["w_in"]), _pad_w(params["w_out"]), _pad_w(params["w_loop"])],
        axis=0).astype(jnp.bfloat16)

    agg = {}
    for name in ("in", "out"):
        d = graph[name]
        # Per-edge messages: norm_e * (x[tail_e] - rel[type_e]) in f32, cast to
        # bf16 for the MXU scatter (matmul is hoisted out of the scatter by
        # linearity, so the scatter works on (E, C_in) messages only).
        # TODO(synk): these row gathers still run in XLA glue; they could move
        # in-kernel with a manual DMA gather.
        msg = ((x_pad[d["tail"]] - rel_pad[d["type"]])
               * d["norm"][:, None]).astype(jnp.bfloat16)
        agg[name] = _segment_scatter(
            msg, d["heads"], d["blk_start"], d["blk_count"], d["max_blocks"],
            n_pad=n_pad, node_tile=node_tile, edge_tile=edge_tile,
            c_pad=c_in_pad)

    node_out_pad = pl.pallas_call(
        _dense_kernel,
        grid=(n_pad // dense_tile,),
        in_specs=[
            pl.BlockSpec((dense_tile, c_in_pad), lambda i: (i, 0)),     # x
            pl.BlockSpec((1, c_in_pad), lambda i: (0, 0)),              # loop_rel
            pl.BlockSpec((dense_tile, c_in_pad), lambda i: (i, 0)),     # agg_in (bf16)
            pl.BlockSpec((dense_tile, c_in_pad), lambda i: (i, 0)),     # agg_out (bf16)
            pl.BlockSpec((3 * c_in_pad, c_out_pad), lambda i: (0, 0)),  # w_stack
        ],
        out_specs=pl.BlockSpec((dense_tile, c_out_pad), lambda i: (i, 0)),
        out_shape=jax.ShapeDtypeStruct((n_pad, c_out_pad), jnp.float32),
        scratch_shapes=[pltpu.VMEM((dense_tile, 3 * c_in_pad), jnp.bfloat16)],
        compiler_params=pltpu.CompilerParams(
            dimension_semantics=("parallel",),
            vmem_limit_bytes=_VMEM_LIMIT),
    )(x_pad, loop_rel_pad, agg["in"], agg["out"], w_stack)

    node_out = node_out_pad[:N, :C_out]

    # out_2[:-1] == relation_embedding @ weight_rel: tiny matmul, leave to XLA
    # (one fewer custom-call launch / scheduling barrier).
    rel_out2 = jnp.dot(relation_embedding.astype(jnp.float32),
                       params["weight_rel"].astype(jnp.float32))
    return node_out, rel_out2


# --------------------------- pure-JAX reference --------------------------------


def _reference_forward(x, edge_index, edge_type, rel_emb, params):
    x = x.astype(jnp.float32)
    N = x.shape[0]
    rel_full = jnp.concatenate(
        [rel_emb.astype(jnp.float32), params["loop_rel"].astype(jnp.float32)], 0)
    E = edge_index.shape[1] // 2
    in_index, out_index = edge_index[:, :E], edge_index[:, E:]
    in_type, out_type = edge_type[:E], edge_type[E:]

    def prop(idx, typ, w, norm):
        msg = (x[idx[1]] - rel_full[typ]) @ w
        if norm is not None:
            msg = msg * norm[:, None]
        return jax.ops.segment_sum(msg, idx[0], num_segments=N)

    in_norm = _normalization(in_index[0], in_index[1], N)
    out_norm = _normalization(out_index[0], out_index[1], N)
    in_res = prop(in_index, in_type, params["w_in"], in_norm)
    out_res = prop(out_index, out_type, params["w_out"], out_norm)
    loop_res = (x - params["loop_rel"]) @ params["w_loop"]
    out = jnp.tanh((in_res + out_res + loop_res) / 3.0)
    out2 = rel_full @ params["weight_rel"]
    return out, out2[:-1]


# ----------------------------------- main --------------------------------------


if __name__ == "__main__":
    key = jax.random.PRNGKey(0)

    # Small but layout-meaningful shapes (lane-dense after padding C_in 96->128).
    num_nodes = 40
    in_channels = 96
    out_channels = 128
    num_relations = 5
    num_edges = 300                # per direction; edge_index holds 2*num_edges

    keys = jax.random.split(key, 10)

    def xavier(k, shape):
        fan_in, fan_out = shape
        std = (2.0 / (fan_in + fan_out)) ** 0.5
        return std * jax.random.normal(k, shape, dtype=jnp.float32)

    params = {
        "weight_rel": xavier(keys[0], (in_channels, out_channels)),
        "loop_rel":   xavier(keys[1], (1, in_channels)),
        "w_in":       xavier(keys[2], (in_channels, out_channels)),
        "w_out":      xavier(keys[3], (in_channels, out_channels)),
        "w_loop":     xavier(keys[4], (in_channels, out_channels)),
    }

    nodes_features = jax.random.normal(keys[5], (num_nodes, in_channels),
                                       dtype=jnp.float32)
    relation_embedding = jax.random.normal(keys[6], (num_relations, in_channels),
                                           dtype=jnp.float32)
    edge_index = jax.random.randint(keys[7], (2, 2 * num_edges), 0, num_nodes,
                                    dtype=jnp.int32)
    edge_type = jax.random.randint(keys[8], (2 * num_edges,), 0, num_relations,
                                   dtype=jnp.int32)

    # Graph-static preprocessing: done once (one host sync here), reused by
    # every forward of every layer.
    graph = precompute_graph(edge_index, edge_type, num_nodes,
                             node_tile=256, edge_tile=512, dense_tile=256)

    node_out, rel_out = compgcn_forward(nodes_features, relation_embedding,
                                        params, graph)
    jax.block_until_ready((node_out, rel_out))

    ref_node, ref_rel = _reference_forward(nodes_features, edge_index, edge_type,
                                           relation_embedding, params)
    assert node_out.shape == (num_nodes, out_channels)
    assert rel_out.shape == (num_relations, out_channels)
    # bf16 MXU operands with f32 accumulation (matches the module's amp.autocast
    # semantics) => compare against the pure-f32 reference with a loose tolerance.
    assert jnp.allclose(node_out, ref_node, atol=5e-2, rtol=5e-2)
    assert jnp.allclose(rel_out, ref_rel, atol=1e-5, rtol=1e-5)

    print("KERNEL_OK")
</pallas_src>

<mosaic_0001>
module attributes {stable_mosaic.version = 11 : i64} {
  func.func @_scatter_kernel(%arg0: i32, %arg1: i32, %arg2: memref<1xi32, #tpu.memory_space<smem>>, %arg3: memref<1xi32, #tpu.memory_space<smem>>, %arg4: memref<1x512xi32, #tpu.memory_space<vmem>>, %arg5: memref<512x128xbf16, #tpu.memory_space<vmem>>, %arg6: memref<256x128xbf16, #tpu.memory_space<vmem>>, %arg7: memref<256x128xf32, #tpu.memory_space<vmem>>) attributes {dimension_semantics = [#tpu.dimension_semantics<parallel>, #tpu.dimension_semantics<arbitrary>], iteration_bounds = array<i64: 1, 1>, scalar_prefetch = 2 : i64, scratch_operands = 1 : i64, tpu.core_type = #tpu.core_type<tc>, window_params = [{transform_indices = @transform_0, window_bounds = array<i64: 1, 512>}, {transform_indices = @transform_1, window_bounds = array<i64: 512, 128>}, {transform_indices = @transform_2, window_bounds = array<i64: 256, 128>}]} {
    %c0_i32 = arith.constant 0 : i32
    %0 = arith.cmpi eq, %arg1, %c0_i32 : i32
    %1 = arith.extui %0 : i1 to i32
    %c0_i32_0 = arith.constant 0 : i32
    %2 = arith.cmpi ne, %1, %c0_i32_0 : i32
    scf.if %2 {
      %cst = arith.constant 0.000000e+00 : f32
      %11 = vector.broadcast %cst : f32 to vector<256x128xf32>
      %c0 = arith.constant 0 : index
      %c0_4 = arith.constant 0 : index
      %12 = vector.load %arg7[%c0, %c0_4] : memref<256x128xf32, #tpu.memory_space<vmem>>, vector<256x128xf32>
      tpu.vector_store %arg7[%c0, %c0_4], %11 {strides = array<i32>} : memref<256x128xf32, #tpu.memory_space<vmem>>, vector<256x128xf32>,
    } else {
    }
    %3 = arith.index_cast %arg0 : i32 to index
    %4 = memref.load %arg3[%3] : memref<1xi32, #tpu.memory_space<smem>>
    %5 = arith.cmpi slt, %arg1, %4 : i32
    %6 = arith.extui %5 : i1 to i32
    %c0_i32_1 = arith.constant 0 : i32
    %7 = arith.cmpi ne, %6, %c0_i32_1 : i32
    scf.if %7 {
      %11 = tpu.iota {dimensions = array<i32: 0>} : vector<256x512xi32>
      %c256_i32 = arith.constant 256 : i32
      %12 = arith.muli %arg0, %c256_i32 : i32
      %13 = vector.broadcast %12 : i32 to vector<256x512xi32>
      %14 = arith.addi %11, %13 : vector<256x512xi32>
      %c0 = arith.constant 0 : index
      %c0_4 = arith.constant 0 : index
      %15 = vector.load %arg4[%c0, %c0_4] : memref<1x512xi32, #tpu.memory_space<vmem>>, vector<1x512xi32>
      %16 = vector.broadcast %15 : vector<1x512xi32> to vector<256x512xi32>
      %17 = arith.cmpi eq, %14, %16 : vector<256x512xi32>
      %18 = arith.extui %17 : vector<256x512xi1> to vector<256x512xi32>
      %19 = arith.sitofp %18 : vector<256x512xi32> to vector<256x512xf32>
      %20 = arith.truncf %19 : vector<256x512xf32> to vector<256x512xbf16>
      %c0_5 = arith.constant 0 : index
      %c0_6 = arith.constant 0 : index
      %21 = vector.load %arg7[%c0_5, %c0_6] : memref<256x128xf32, #tpu.memory_space<vmem>>, vector<256x128xf32>
      %c0_7 = arith.constant 0 : index
      %c0_8 = arith.constant 0 : index
      %22 = vector.load %arg5[%c0_7, %c0_8] : memref<512x128xbf16, #tpu.memory_space<vmem>>, vector<512x128xbf16>
      %cst = arith.constant dense<0.000000e+00> : vector<256x128xf32>
      %23 = tpu.matmul %20, %22, %cst {dimension_numbers = #tpu.dot_dimension_numbers<[1], [0], [0], [1], [0, 0, 1, 1], [], []>} : vector<256x512xbf16>, vector<512x128xbf16>, vector<256x128xf32> -> vector<256x128xf32>
      %24 = arith.addf %21, %23 : vector<256x128xf32>
      %c0_9 = arith.constant 0 : index
      %c0_10 = arith.constant 0 : index
      %25 = vector.load %arg7[%c0_9, %c0_10] : memref<256x128xf32, #tpu.memory_space<vmem>>, vector<256x128xf32>
      tpu.vector_store %arg7[%c0_9, %c0_10], %24 {strides = array<i32>} : memref<256x128xf32, #tpu.memory_space<vmem>>, vector<256x128xf32>,
    } else {
    }
    %c0_i32_2 = arith.constant 0 : i32
    %8 = arith.cmpi eq, %arg1, %c0_i32_2 : i32
    %9 = arith.extui %8 : i1 to i32
    %c0_i32_3 = arith.constant 0 : i32
    %10 = arith.cmpi ne, %9, %c0_i32_3 : i32
    scf.if %10 {
      %c0 = arith.constant 0 : index
      %c0_4 = arith.constant 0 : index
      %11 = vector.load %arg7[%c0, %c0_4] : memref<256x128xf32, #tpu.memory_space<vmem>>, vector<256x128xf32>
      %12 = arith.truncf %11 : vector<256x128xf32> to vector<256x128xbf16>
      %c0_5 = arith.constant 0 : index
      %c0_6 = arith.constant 0 : index
      %13 = vector.load %arg6[%c0_5, %c0_6] : memref<256x128xbf16, #tpu.memory_space<vmem>>, vector<256x128xbf16>
      tpu.vector_store %arg6[%c0_5, %c0_6], %12 {strides = array<i32>} : memref<256x128xbf16, #tpu.memory_space<vmem>>, vector<256x128xbf16>,
    } else {
    }
    return
  }
  func.func @transform_0(%arg0: i32, %arg1: i32, %arg2: memref<1xi32, #tpu.memory_space<smem>>, %arg3: memref<1xi32, #tpu.memory_space<smem>>) -> (i32, i32) {
    %0 = arith.index_cast %arg0 : i32 to index
    %1 = memref.load %arg2[%0] : memref<1xi32, #tpu.memory_space<smem>>
    %2 = arith.index_cast %arg0 : i32 to index
    %3 = memref.load %arg3[%2] : memref<1xi32, #tpu.memory_space<smem>>
    %c1_i32 = arith.constant 1 : i32
    %4 = arith.subi %3, %c1_i32 : i32
    %c0_i32 = arith.constant 0 : i32
    %5 = arith.maxsi %4, %c0_i32 : i32
    %6 = arith.minsi %arg1, %5 : i32
    %7 = arith.addi %1, %6 : i32
    %c0_i32_0 = arith.constant 0 : i32
    %c0_i32_1 = arith.constant 0 : i32
    return %c0_i32_0, %7 : i32, i32
  }
  func.func @transform_1(%arg0: i32, %arg1: i32, %arg2: memref<1xi32, #tpu.memory_space<smem>>, %arg3: memref<1xi32, #tpu.memory_space<smem>>) -> (i32, i32) {
    %0 = arith.index_cast %arg0 : i32 to index
    %1 = memref.load %arg2[%0] : memref<1xi32, #tpu.memory_space<smem>>
    %2 = arith.index_cast %arg0 : i32 to index
    %3 = memref.load %arg3[%2] : memref<1xi32, #tpu.memory_space<smem>>
    %c1_i32 = arith.constant 1 : i32
    %4 = arith.subi %3, %c1_i32 : i32
    %c0_i32 = arith.constant 0 : i32
    %5 = arith.maxsi %4, %c0_i32 : i32
    %6 = arith.minsi %arg1, %5 : i32
    %7 = arith.addi %1, %6 : i32
    %c0_i32_0 = arith.constant 0 : i32
    %c0_i32_1 = arith.constant 0 : i32
    return %7, %c0_i32_0 : i32, i32
  }
  func.func @transform_2(%arg0: i32, %arg1: i32, %arg2: memref<1xi32, #tpu.memory_space<smem>>, %arg3: memref<1xi32, #tpu.memory_space<smem>>) -> (i32, i32) {
    %c0_i32 = arith.constant 0 : i32
    %c0_i32_0 = arith.constant 0 : i32
    return %arg0, %c0_i32 : i32, i32
  }
}

</mosaic_0001>

<bundles_post_ra>
// kernel: tpu_custom_call.1
= control target key start
LH: loop header
LB: loop body
LE: loop exit
PB: predicated region body
PF: predicated region fallthrough
CT: control target
= control target key end

     0   :  { %11 = vsyncpa [#allocation7], 0  ;;  %s3383_s0 = inlined_call_operand.<no memory space> [shape: s32[1], index: 0, kind: input, shape index: {}]   ;;  %s3384_s1 = inlined_call_operand.<no memory space> [shape: s32[1], index: 1, kind: input, shape index: {}]   ;;  %s3385_s2 = inlined_call_operand.vmem [shape: s32[1,512], index: 2, kind: input, shape index: {}]   ;;  %s3386_s3 = inlined_call_operand.hbm [shape: bf16[512,128], index: 3, kind: input, shape index: {}]   ;;  %s3387_s4 = inlined_call_operand.hbm [shape: bf16[256,128], index: 4, kind: output, shape index: {}]  }
   0x1   :  { %12 = vsyncpa [#allocation8], 0  ;;  %s1570_s17 = sadd.s32 4294967295, %s3384_s1  ;;  %s2345_s18 = smov [#allocation6]  }
   0x2   :  { %p41_p0 = scmp.gt.s32.totalorder %s1570_s17, 0  ;;  %s52_s19 = sshll.u32 %s2345_s18, 4  ;;  %s53_s19 = int_to_ptr.vmem [resolvable:$true] %s52_s19 }
   0x3   :  { %s2297_s30 = scalar_lea.hbm %s3386_s3, 4096 }
   0x4   :  { %s3600_s17 = smov (!%p41_p0, %s1570_s17), 0 }
   0x5   :  { %s3602_s17 = smov (%p41_p0, %s3600_s17), 0 }
   0x6   :  { %s2382_s22 = sadd.s32 %s3602_s17, %s3383_s0 }
   0x7   :  { %s1902_s23 = sshll.u32 %s2382_s22, 12 }
   0x8   :  { %s51_s26 = scalar_lea.hbm %s3386_s3, %s1902_s23 }
   0x9   :  { %s2295_s27 = scalar_lea.hbm %s51_s26, 4096  ;;  %p2298_p2 = scmp.lt.u32.totalorder %s51_s26, %s3386_s3 }
   0xa   :  { %p2296_p1 = scmp.ne.s32.totalorder %s51_s26, %s2295_s27  ;;  %p2299_p3 = scmp.lt.u32.totalorder %s2297_s30, %s2295_s27 }
   0xb   :  { %p2301_p5 = scmp.lt.u32.totalorder %s2295_s27, %s51_s26 }
   0xc   :  { %p2300_p4 = por %p2299_p3, %p2298_p2 }
   0xe   :  { %p2302_p6 = por %p2301_p5, %p2300_p4 }
  0x10   :  { %p2303_p7 = pnand %p2302_p6, %p2296_p1 }
  0x12   :  { %2306 = shalt.err (!%p2303_p7)
}
  0x13   :  { %s2307_s0 = scalar_lea.vmem %s53_s19, 4096  ;;  %p2312_p9 = scmp.lt.s32.totalorder %s53_s19, %s53_s19 }
  0x14   :  { %p2308_p8 = scmp.ne.s32.totalorder %s53_s19, %s2307_s0  ;;  %p2313_p10 = scmp.lt.s32.totalorder %s2307_s0, %s2307_s0 }
  0x16   :  { %p2314_p11 = por %p2313_p10, %p2312_p9 }
  0x18   :  { %p2315_p12 = pnand %p2314_p11, %p2308_p8 }
  0x1a   :  { %2318 = shalt.err (!%p2315_p12)
}
  0x1b   :  { %s2346_s7 = smov 64   ;;  %s2347_s8 = smov 4  }
  0x1c   :  { %58 = dma.hbm_to_vmem [thread:$0]  %s51_s26, 4096, %s53_s19, [#allocation7], %s2346_s7, %s2346_s7, %s2347_s8  }
  0x1d   :  { %2341 = dma.done.wait [#allocation7], 4096  }
  0x1e   :  { %2342 = vsyncadd [#allocation7], 4294963200  ;;  %s1576_s3 = sshll.u32 %s2382_s22, 2  ;;  %v2348_v0 = vmov 0.0   ;;  %p1578_p0 = scmp.le.s32.totalorder %s3384_s1, 0 }
  0x1f   :  { %p2400_p13 = scmp.lt.s32.totalorder %s1576_s3, 3  ;;  %109 = vst [vmem:[#allocation2] sm:$0xff] %v2348_v0  ;;  %110 = vst [vmem:[#allocation2 + $0x8] sm:$0xff] %v2348_v0  ;;  %v2263_v1 = vld [vmem:[#allocation6 + $0x40] sm:$0xff] (!%p1578_p0)   ;;  %v2267_v5 = vld [vmem:[#allocation6 + $0x48] sm:$0xff] (!%p1578_p0)   ;;  %v146_v20 = vlaneseq (!%p1578_p0)  ;;  %v3491_v50 = vmov (!%p1578_p0), 0 }
  0x20   :  { %111 = vst [vmem:[#allocation2 + $0x10] sm:$0xff] %v2348_v0  ;;  %112 = vst [vmem:[#allocation2 + $0x18] sm:$0xff] %v2348_v0  ;;  %v2264_v2 = vld [vmem:[#allocation6 + $0xc0] sm:$0xff] (!%p1578_p0)   ;;  %2033 = vmatprep.subr.bf16.mxu0 (!%p1578_p0), %v2263_v1  ;;  %v2268_v6 = vld [vmem:[#allocation6 + $0xc8] sm:$0xff] (!%p1578_p0)   ;;  %v2349_v47 = vmov (!%p1578_p0), 1.0|1.0  }
  0x21   :  { %113 = vst [vmem:[#allocation2 + $0x20] sm:$0xff] %v2348_v0  ;;  %114 = vst [vmem:[#allocation2 + $0x28] sm:$0xff] %v2348_v0  ;;  %s3604_s3 = smov (!%p2400_p13, %s1576_s3), 3  ;;  %v2265_v3 = vld [vmem:[#allocation6] sm:$0xff] (!%p1578_p0)   ;;  %2145 = vmatprep.subr.bf16.mxu1 (!%p1578_p0), %v2264_v2  ;;  %v2269_v7 = vld [vmem:[#allocation6 + $0x8] sm:$0xff] (!%p1578_p0)   ;;  %v2417_v25 = vshrl.u32 (!%p1578_p0), %v146_v20, 7 }
  0x22   :  { %115 = vst [vmem:[#allocation2 + $0x30] sm:$0xff] %v2348_v0  ;;  %116 = vst [vmem:[#allocation2 + $0x38] sm:$0xff] %v2348_v0  ;;  %s85_s12 = scalar_lea.vmem %s3385_s2, %s3604_s3  ;;  %v2266_v4 = vld [vmem:[#allocation6 + $0x80] sm:$0xff] (!%p1578_p0)   ;;  %2034 = vmatpush3.bf16.msra.mxu0 (!%p1578_p0), %v2265_v3  ;;  %v2270_v8 = vld [vmem:[#allocation6 + $0x88] sm:$0xff] (!%p1578_p0)   ;;  %v3535_v62 = vmov (!%p1578_p0), 0 }
  0x23   :  { %117 = vst [vmem:[#allocation2 + $0x40] sm:$0xff] %v2348_v0  ;;  %118 = vst [vmem:[#allocation2 + $0x48] sm:$0xff] %v2348_v0  ;;  %2146 = vmatpush3.bf16.msra.mxu1 (!%p1578_p0), %v2266_v4  ;;  %2035 = vmatprep.subr.bf16.mxu0 (!%p1578_p0), %v2267_v5  ;;  %v2271_v9 = vld [vmem:[#allocation6 + $0x50] sm:$0xff] (!%p1578_p0)   ;;  %v2275_v13 = vld [vmem:[#allocation6 + $0x58] sm:$0xff] (!%p1578_p0)   ;;  %v220_v30 = vsub.s32 (!%p1578_p0), 1, %v2417_v25  ;;  %v228_v32 = vsub.s32 (!%p1578_p0), 3, %v2417_v25 }
  0x24   :  { %119 = vst [vmem:[#allocation2 + $0x50] sm:$0xff] %v2348_v0  ;;  %120 = vst [vmem:[#allocation2 + $0x58] sm:$0xff] %v2348_v0  ;;  %2147 = vmatprep.subr.bf16.mxu1 (!%p1578_p0), %v2268_v6  ;;  %v2272_v10 = vld [vmem:[#allocation6 + $0xd0] sm:$0xff] (!%p1578_p0)   ;;  %v2276_v14 = vld [vmem:[#allocation6 + $0xd8] sm:$0xff] (!%p1578_p0)   ;;  %v216_v34 = vsub.s32 (!%p1578_p0), 0, %v2417_v25  ;;  %v224_v36 = vsub.s32 (!%p1578_p0), 2, %v2417_v25 }
  0x25   :  { %121 = vst [vmem:[#allocation2 + $0x60] sm:$0xff] %v2348_v0  ;;  %122 = vst [vmem:[#allocation2 + $0x68] sm:$0xff] %v2348_v0  ;;  %v2273_v11 = vld [vmem:[#allocation6 + $0x10] sm:$0xff] (!%p1578_p0)   ;;  %v2277_v15 = vld [vmem:[#allocation6 + $0x18] sm:$0xff] (!%p1578_p0)   ;;  %v148_v39 = vadd.s32 (!%p1578_p0), 8, %v2417_v25  ;;  %v149_v41 = vadd.s32 (!%p1578_p0), 16, %v2417_v25 }
  0x26   :  { %123 = vst [vmem:[#allocation2 + $0x70] sm:$0xff] %v2348_v0  ;;  %124 = vst [vmem:[#allocation2 + $0x78] sm:$0xff] %v2348_v0  ;;  %2036 = vmatpush3.bf16.msra.mxu0 (!%p1578_p0), %v2269_v7  ;;  %v2274_v12 = vld [vmem:[#allocation6 + $0x90] sm:$0xff] (!%p1578_p0)   ;;  %v2278_v16 = vld [vmem:[#allocation6 + $0x98] sm:$0xff] (!%p1578_p0)   ;;  %v150_v42 = vadd.s32 (!%p1578_p0), 24, %v2417_v25  ;;  %v151_v48 = vadd.s32 (!%p1578_p0), 32, %v2417_v25 }
  0x27   :  { %125 = vst [vmem:[#allocation2 + $0x80] sm:$0xff] %v2348_v0  ;;  %126 = vst [vmem:[#allocation2 + $0x88] sm:$0xff] %v2348_v0  ;;  %2148 = vmatpush3.bf16.msra.mxu1 (!%p1578_p0), %v2270_v8  ;;  %2037 = vmatprep.subr.bf16.mxu0 (!%p1578_p0), %v2271_v9  ;;  %v2279_v17 = vld [vmem:[#allocation6 + $0x60] sm:$0xff] (!%p1578_p0)   ;;  %v2283_v22 = vld [vmem:[#allocation6 + $0x68] sm:$0xff] (!%p1578_p0)   ;;  %v152_v49 = vadd.s32 (!%p1578_p0), 40, %v2417_v25  ;;  %v2476_v51 = vadd.s32 (!%p1578_p0), 48, %v2417_v25 }
  0x28   :  { %127 = vst [vmem:[#allocation2 + $0x90] sm:$0xff] %v2348_v0  ;;  %128 = vst [vmem:[#allocation2 + $0x98] sm:$0xff] %v2348_v0  ;;  %145 = sbr.rel (%p1578_p0) target bundleno = 413 (0x19d), region = 21  ;;  %2149 = vmatprep.subr.bf16.mxu1 (!%p1578_p0), %v2272_v10  ;;  %v2280_v18 = vld [vmem:[#allocation6 + $0xe0] sm:$0xff] (!%p1578_p0)   ;;  %v2284_v23 = vld [vmem:[#allocation6 + $0xe8] sm:$0xff] (!%p1578_p0)   ;;  %v2483_v53 = vadd.s32 (!%p1578_p0), 56, %v2417_v25 }
  0x29   :  { %129 = vst [vmem:[#allocation2 + $0xa0] sm:$0xff] %v2348_v0  ;;  %130 = vst [vmem:[#allocation2 + $0xa8] sm:$0xff] %v2348_v0  ;;  %v2281_v19 = vld [vmem:[#allocation6 + $0x20] sm:$0xff] (!%p1578_p0)   ;;  %v2285_v24 = vld [vmem:[#allocation6 + $0x28] sm:$0xff] (!%p1578_p0)   ;;  %v2486_v54 = vadd.s32 (!%p1578_p0), 64, %v2417_v25  ;;  %v2489_v55 = vadd.s32 (!%p1578_p0), 72, %v2417_v25 }
  0x2a   :  { %131 = vst [vmem:[#allocation2 + $0xb0] sm:$0xff] %v2348_v0  ;;  %132 = vst [vmem:[#allocation2 + $0xb8] sm:$0xff] %v2348_v0  ;;  %2038 = vmatpush3.bf16.msra.mxu0 (!%p1578_p0), %v2273_v11  ;;  %v2282_v21 = vld [vmem:[#allocation6 + $0xa0] sm:$0xff] (!%p1578_p0)   ;;  %v2286_v26 = vld [vmem:[#allocation6 + $0xa8] sm:$0xff] (!%p1578_p0)   ;;  %v2492_v56 = vadd.s32 (!%p1578_p0), 80, %v2417_v25  ;;  %v2499_v58 = vadd.s32 (!%p1578_p0), 88, %v2417_v25 }
  0x2b   :  { %133 = vst [vmem:[#allocation2 + $0xc0] sm:$0xff] %v2348_v0  ;;  %134 = vst [vmem:[#allocation2 + $0xc8] sm:$0xff] %v2348_v0  ;;  %2150 = vmatpush3.bf16.msra.mxu1 (!%p1578_p0), %v2274_v12  ;;  %2039 = vmatprep.subr.bf16.mxu0 (!%p1578_p0), %v2275_v13  ;;  %v2287_v27 = vld [vmem:[#allocation6 + $0x70] sm:$0xff] (!%p1578_p0)   ;;  %v2291_v33 = vld [vmem:[#allocation6 + $0x78] sm:$0xff] (!%p1578_p0)   ;;  %v2502_v59 = vadd.s32 (!%p1578_p0), 96, %v2417_v25  ;;  %v2505_v60 = vadd.s32 (!%p1578_p0), 104, %v2417_v25 }
  0x2c   :  { %135 = vst [vmem:[#allocation2 + $0xd0] sm:$0xff] %v2348_v0  ;;  %136 = vst [vmem:[#allocation2 + $0xd8] sm:$0xff] %v2348_v0  ;;  %2151 = vmatprep.subr.bf16.mxu1 (!%p1578_p0), %v2276_v14  ;;  %v2288_v28 = vld [vmem:[#allocation6 + $0xf0] sm:$0xff] (!%p1578_p0)   ;;  %v2292_v35 = vld [vmem:[#allocation6 + $0xf8] sm:$0xff] (!%p1578_p0)   ;;  %v2508_v61 = vadd.s32 (!%p1578_p0), 144, %v2417_v25  ;;  %v2515_v63 = vadd.s32 (!%p1578_p0), 152, %v2417_v25 }
  0x2d   :  { %137 = vst [vmem:[#allocation2 + $0xe0] sm:$0xff] %v2348_v0  ;;  %138 = vst [vmem:[#allocation2 + $0xe8] sm:$0xff] %v2348_v0  ;;  %v2289_v29 = vld [vmem:[#allocation6 + $0x30] sm:$0xff] (!%p1578_p0)   ;;  %v2293_v37 = vld [vmem:[#allocation6 + $0x38] sm:$0xff] (!%p1578_p0)   ;;  %v2521_v1 = vadd.s32 (!%p1578_p0), 168, %v2417_v25  ;;  %v2524_v2 = vadd.s32 (!%p1578_p0), 176, %v2417_v25 }
  0x2e   :  { %139 = vst [vmem:[#allocation2 + $0xf0] sm:$0xff] %v2348_v0  ;;  %140 = vst [vmem:[#allocation2 + $0xf8] sm:$0xff] %v2348_v0  ;;  %2040 = vmatpush3.bf16.msra.mxu0 (!%p1578_p0), %v2277_v15  ;;  %v2290_v31 = vld [vmem:[#allocation6 + $0xb0] sm:$0xff] (!%p1578_p0)   ;;  %v2294_v38 = vld [vmem:[#allocation6 + $0xb8] sm:$0xff] (!%p1578_p0)   ;;  %v2518_v0 = vadd.s32 (!%p1578_p0), 160, %v2417_v25  ;;  %v2530_v3 = vadd.s32 (!%p1578_p0), 184, %v2417_v25 }
  0x2f   :  { %2152 = vmatpush3.bf16.msra.mxu1 %v2278_v16  ;;  %2041 = vmatprep.subr.bf16.mxu0 %v2279_v17  ;;  %v213_v40 = vld [vmem:[%s85_s12] sm:$0xf]  ;;  %v2533_v4 = vadd.s32 192, %v2417_v25  ;;  %v2536_v5 = vadd.s32 200, %v2417_v25  ;;  %v2539_v6 = vadd.s32 208, %v2417_v25  ;;  %v2550_v7 = vadd.s32 216, %v2417_v25 }
  0x30   :  { %2153 = vmatprep.subr.bf16.mxu1 %v2280_v18  ;;  %v2431_v43 = vrot.slane %v213_v40, %v220_v30  ;;  %v2433_v44 = vrot.slane %v213_v40, %v228_v32  ;;  %v2435_v45 = vrot.slane %v213_v40, %v216_v34  ;;  %v2437_v46 = vrot.slane %v213_v40, %v224_v36  ;;  %v678_v14 = vld [vmem:[#allocation2] sm:$0xff] }
  0x31   :  { %v2553_v8 = vadd.s32 224, %v2417_v25  ;;  %v2561_v9 = vadd.s32 232, %v2417_v25  ;;  %v2564_v10 = vadd.s32 240, %v2417_v25  ;;  %v2666_v15 = vadd.s32 248, %v2417_v25 }
  0x32   :  { %2042 = vmatpush3.bf16.msra.mxu0 %v2281_v19  ;;  %vm231_vm0 = vcmp.eq.s32.totalorder %v2417_v25, %v2431_v43  ;;  %vm235_vm1 = vcmp.eq.s32.totalorder %v148_v39, %v2431_v43  ;;  %vm233_vm2 = vcmp.eq.s32.totalorder %v2417_v25, %v2433_v44  ;;  %vm237_vm3 = vcmp.eq.s32.totalorder %v148_v39, %v2433_v44  ;;  %v679_v19 = vld [vmem:[#allocation2 + $0x8] sm:$0xff] }
  0x33   :  { %2154 = vmatpush3.bf16.msra.mxu1 %v2282_v21  ;;  %2043 = vmatprep.subr.bf16.mxu0 %v2283_v22  ;;  %vm1739_vm4 = vmpackc.low %vm235_vm1, %vm231_vm0  ;;  %vm230_vm5 = vcmp.eq.s32.totalorder %v2417_v25, %v2435_v45  ;;  %vm234_vm6 = vcmp.eq.s32.totalorder %v148_v39, %v2435_v45  ;;  %vm232_vm7 = vcmp.eq.s32.totalorder %v2417_v25, %v2437_v46  ;;  %v3439_v30 = vmov 0 }
  0x34   :  { %2155 = vmatprep.subr.bf16.mxu1 %v2284_v23  ;;  %vm236_vm8 = vcmp.eq.s32.totalorder %v148_v39, %v2437_v46  ;;  %1740 = vmatprep.mubr.msk.bf16.mxu0 %vm1739_vm4, %v2349_v47  ;;  %vm1803_vm9 = vmpackc.low %vm237_vm3, %vm233_vm2  ;;  %vm239_vm10 = vcmp.eq.s32.totalorder %v149_v41, %v2431_v43  ;;  %vm243_vm11 = vcmp.eq.s32.totalorder %v150_v42, %v2431_v43  ;;  %v3447_v32 = vmov 0 }
  0x35   :  { %1804 = vmatprep.mubr.msk.bf16.mxu1 %vm1803_vm9, %v2349_v47  ;;  %vm1741_vm12 = vmpackc.low %vm234_vm6, %vm230_vm5  ;;  %vm241_vm13 = vcmp.eq.s32.totalorder %v149_v41, %v2433_v44  ;;  %vm245_vm14 = vcmp.eq.s32.totalorder %v150_v42, %v2433_v44  ;;  %vm238_vm1 = vcmp.eq.s32.totalorder %v149_v41, %v2435_v45  ;;  %vm242_vm2 = vcmp.eq.s32.totalorder %v150_v42, %v2435_v45 }
  0x36   :  { %2044 = vmatpush3.bf16.msra.mxu0 %v2285_v24  ;;  %vm1805_vm15 = vmpackc.low %vm236_vm8, %vm232_vm7  ;;  %vm240_vm4 = vcmp.eq.s32.totalorder %v149_v41, %v2437_v46  ;;  %vm244_vm5 = vcmp.eq.s32.totalorder %v150_v42, %v2437_v46  ;;  %vm247_vm6 = vcmp.eq.s32.totalorder %v151_v48, %v2431_v43  ;;  %vm251_vm7 = vcmp.eq.s32.totalorder %v152_v49, %v2431_v43 }
  0x37   :  { %2156 = vmatpush3.bf16.msra.mxu1 %v2286_v26  ;;  %2045 = vmatprep.subr.bf16.mxu0 %v2287_v27  ;;  %vm1743_vm0 = vmpackc.low %vm243_vm11, %vm239_vm10  ;;  %vm249_vm9 = vcmp.eq.s32.totalorder %v151_v48, %v2433_v44  ;;  %vm253_vm10 = vcmp.eq.s32.totalorder %v152_v49, %v2433_v44  ;;  %v3430_v24 = vmov 0  ;;  %v3434_v26 = vmov 0 }
  0x38   :  { %2157 = vmatprep.subr.bf16.mxu1 %v2288_v28  ;;  %vm1807_vm3 = vmpackc.low %vm245_vm14, %vm241_vm13  ;;  %vm246_vm14 = vcmp.eq.s32.totalorder %v151_v48, %v2435_v45  ;;  %v3437_v27 = vmov 0  ;;  %v161_v28 = vadd.s32 112, %v2417_v25  ;;  %v3455_v34 = vmov 0 }
  0x39   :  { %vm2469_vm8 = vmpackc.low %vm242_vm2, %vm238_vm1  ;;  %vm252_vm1 = vcmp.eq.s32.totalorder %v152_v49, %v2437_v46  ;;  %vm255_vm2 = vcmp.eq.s32.totalorder %v2476_v51, %v2431_v43  ;;  %v3461_v36 = vmov 0  ;;  %v3469_v39 = vmov 0 }
  0x3a   :  { %2046 = vmatpush3.bf16.msra.mxu0 %v2289_v29  ;;  %vm2478_vm11 = vmpackc.low %vm244_vm5, %vm240_vm4  ;;  %vm257_vm4 = vcmp.eq.s32.totalorder %v2476_v51, %v2433_v44  ;;  %vm261_vm5 = vcmp.eq.s32.totalorder %v2483_v53, %v2433_v44  ;;  %v162_v29 = vadd.s32 120, %v2417_v25  ;;  %v3471_v40 = vmov 0 }
  0x3b   :  { %2158 = vmatpush3.bf16.msra.mxu1 %v2290_v31  ;;  %2047 = vmatprep.subr.bf16.mxu0 %v2291_v33  ;;  %vm2510_vm13 = vmpackc.low %vm253_vm10, %vm249_vm9  ;;  %vm260_vm10 = vcmp.eq.s32.totalorder %v2483_v53, %v2437_v46  ;;  %v3443_v31 = vmov 0  ;;  %v3451_v33 = vmov 0  ;;  %v163_v41 = vadd.s32 128, %v2417_v25 }
  0x3c   :  { %2159 = vmatprep.subr.bf16.mxu1 %v2292_v35  ;;  %v3457_v35 = vmov 0  ;;  %v164_v42 = vadd.s32 136, %v2417_v25  ;;  %v3480_v25 = vmov 0 }
  0x3e   :  { %2048 = vmatpush3.bf16.msra.mxu0 %v2293_v37  ;;  %v3463_v37 = vmov 0 }
  0x3f   :  { %2160 = vmatpush3.bf16.msra.mxu1 %v2294_v38  ;;  %v3465_v38 = vmov 0 }
  0x41   :  { %1742 = vmatmul.mubr.msk.bf16.vlgmr.msra.gmra.mrb[0].mxu0 %vm1741_vm12, %v2349_v47  ;;  %vm2494_vm12 = vmpackc.low %vm251_vm7, %vm247_vm6  ;;  %vm254_vm7 = vcmp.eq.s32.totalorder %v2476_v51, %v2435_v45 }
  0x42   :  { %1806 = vmatmul.mubr.msk.bf16.vlgmr.msra.gmra.mrb[0].mxu1 %vm1805_vm15, %v2349_v47  ;;  %1744 = vmatprep.mubr.msk.bf16.mxu0 %vm1743_vm0, %v2349_v47  ;;  %vm250_vm15 = vcmp.eq.s32.totalorder %v152_v49, %v2435_v45  ;;  %vm248_vm0 = vcmp.eq.s32.totalorder %v151_v48, %v2437_v46  ;;  %v3475_v48 = vmov 0  ;;  %v3486_v49 = vmov 0 }
  0x43   :  { %1808 = vmatprep.mubr.msk.bf16.mxu1 %vm1807_vm3, %v2349_v47  ;;  %vm259_vm3 = vcmp.eq.s32.totalorder %v2483_v53, %v2431_v43  ;;  %vm2574_vm6 = vmpackc.low %vm250_vm15, %vm246_vm14  ;;  %vm269_vm15 = vcmp.eq.s32.totalorder %v2489_v55, %v2433_v44 }
  0x44   :  { %vm2598_vm9 = vmpackc.low %vm259_vm3, %vm255_vm2  ;;  %vm264_vm3 = vcmp.eq.s32.totalorder %v2486_v54, %v2437_v46 }
  0x45   :  { %vm2618_vm2 = vmpackc.low %vm261_vm5, %vm257_vm4  ;;  %vm271_vm5 = vcmp.eq.s32.totalorder %v2492_v56, %v2431_v43  ;;  %vm281_vm4 = vcmp.eq.s32.totalorder %v2502_v59, %v2433_v44 }
  0x49   :  { %1746 = vmatmul.mubr.msk.bf16.gmra.mrb[4].mxu0 %vm2469_vm8, %v2349_v47  ;;  %vm258_vm8 = vcmp.eq.s32.totalorder %v2483_v53, %v2435_v45 }
  0x4a   :  { %1810 = vmatmul.mubr.msk.bf16.gmra.mrb[4].mxu1 %vm2478_vm11, %v2349_v47  ;;  %1748 = vmatprep.mubr.msk.bf16.mxu0 %vm2494_vm12, %v2349_v47  ;;  %vm2586_vm11 = vmpackc.low %vm252_vm1, %vm248_vm0  ;;  %vm262_vm0 = vcmp.eq.s32.totalorder %v2486_v54, %v2435_v45  ;;  %vm275_vm12 = vcmp.eq.s32.totalorder %v2499_v58, %v2431_v43  ;;  %vm3450_vm1 = vcmp.eq.s32.totalorder %v2515_v63, %v2435_v45 }
  0x4b   :  { %1812 = vmatprep.mubr.msk.bf16.mxu1 %vm2510_vm13, %v2349_v47  ;;  %vm2701_vm14 = vmpackc.low %vm258_vm8, %vm254_vm7  ;;  %vm3407_vm7 = vcmp.eq.s32.totalorder %v2476_v51, %v2437_v46  ;;  %vm3449_vm13 = vcmp.eq.s32.totalorder %v2508_v61, %v2435_v45  ;;  %v3495_v51 = vmov 0 }
  0x4c   :  { %vm2721_vm8 = vmpackc.low %vm260_vm10, %vm3407_vm7  ;;  %vm3411_vm10 = vcmp.eq.s32.totalorder %v2489_v55, %v2431_v43 }
  0x51   :  { %1750 = vmatmul.mubr.msk.bf16.gmra.mrb[8].mxu0 %vm2574_vm6, %v2349_v47  ;;  %vm273_vm6 = vcmp.eq.s32.totalorder %v2492_v56, %v2433_v44 }
  0x52   :  { %1814 = vmatmul.mubr.msk.bf16.gmra.mrb[8].mxu1 %vm2586_vm11, %v2349_v47  ;;  %1752 = vmatprep.mubr.msk.bf16.mxu0 %vm2598_vm9, %v2349_v47  ;;  %vm3410_vm11 = vcmp.eq.s32.totalorder %v2486_v54, %v2431_v43 }
  0x53   :  { %1816 = vmatprep.mubr.msk.bf16.mxu1 %vm2618_vm2, %v2349_v47  ;;  %vm2739_vm7 = vmpackc.low %vm3411_vm10, %vm3410_vm11  ;;  %vm3414_vm2 = vcmp.eq.s32.totalorder %v2486_v54, %v2433_v44  ;;  %vm285_vm10 = vcmp.eq.s32.totalorder %v2505_v60, %v2433_v44  ;;  %v682_v54 = vld [vmem:[#allocation2 + $0x20] sm:$0xff] }
  0x54   :  { %vm2757_vm11 = vmpackc.low %vm269_vm15, %vm3414_vm2 }
  0x55   :  { %vm2895_vm9 = vmpackc.low %vm285_vm10, %vm281_vm4  ;;  %vm278_vm4 = vcmp.eq.s32.totalorder %v2502_v59, %v2435_v45  ;;  %vm282_vm10 = vcmp.eq.s32.totalorder %v2505_v60, %v2435_v45 }
  0x56   :  { %v3440_v30 = vsel %vm2895_vm9, 4294967295, %v3439_v30  ;;  %vm3454_vm9 = vcmp.eq.s32.totalorder %v2515_v63, %v2437_v46 }
  0x59   :  { %1754 = vmatmul.mubr.msk.bf16.gmra.mrb[12].mxu0 %vm2701_vm14, %v2349_v47  ;;  %vm3417_vm14 = vcmp.eq.s32.totalorder %v2489_v55, %v2435_v45 }
  0x5a   :  { %1818 = vmatmul.mubr.msk.bf16.gmra.mrb[12].mxu1 %vm2721_vm8, %v2349_v47  ;;  %1756 = vmatprep.mubr.msk.bf16.mxu0 %vm2739_vm7, %v2349_v47  ;;  %vm2792_vm2 = vmpackc.low %vm3417_vm14, %vm262_vm0  ;;  %vm3420_vm0 = vcmp.eq.s32.totalorder %v2489_v55, %v2437_v46  ;;  %vm3428_vm14 = vcmp.eq.s32.totalorder %v2492_v56, %v2435_v45  ;;  %vm3432_vm8 = vcmp.eq.s32.totalorder %v2492_v56, %v2437_v46 }
  0x5b   :  { %1820 = vmatprep.mubr.msk.bf16.mxu1 %vm2757_vm11, %v2349_v47  ;;  %vm2811_vm7 = vmpackc.low %vm3420_vm0, %vm264_vm3  ;;  %vm283_vm0 = vcmp.eq.s32.totalorder %v2505_v60, %v2431_v43  ;;  %vm3433_vm11 = vcmp.eq.s32.totalorder %v2499_v58, %v2437_v46 }
  0x5c   :  { %vm2829_vm3 = vmpackc.low %vm275_vm12, %vm271_vm5  ;;  %vm3425_vm12 = vcmp.eq.s32.totalorder %v2499_v58, %v2433_v44 }
  0x5d   :  { %vm2847_vm5 = vmpackc.low %vm3425_vm12, %vm273_vm6  ;;  %vm3429_vm6 = vcmp.eq.s32.totalorder %v2499_v58, %v2435_v45 }
  0x5e   :  { %vm2865_vm12 = vmpackc.low %vm3429_vm6, %vm3428_vm14  ;;  %vm3436_vm14 = vcmp.eq.s32.totalorder %v2502_v59, %v2431_v43 }
  0x5f   :  { %v3431_v24 = vsel %vm2865_vm12, 4294967295, %v3430_v24  ;;  %vm2879_vm15 = vmpackc.low %vm3433_vm11, %vm3432_vm8  ;;  %vm3441_vm8 = vcmp.eq.s32.totalorder %v2508_v61, %v2431_v43  ;;  %vm3442_vm11 = vcmp.eq.s32.totalorder %v2515_v63, %v2431_v43 }
  0x60   :  { %v3435_v26 = vsel %vm2879_vm15, 4294967295, %v3434_v26  ;;  %vm2886_vm6 = vmpackc.low %vm283_vm0, %vm3436_vm14  ;;  %vm280_vm14 = vcmp.eq.s32.totalorder %v2502_v59, %v2437_v46  ;;  %v683_v59 = vld [vmem:[#allocation2 + $0x28] sm:$0xff] }
  0x61   :  { %v3438_v27 = vsel %vm2886_vm6, 4294967295, %v3437_v27  ;;  %1758 = vmatmul.mubr.msk.bf16.gmra.mrb[16].mxu0 %vm2792_vm2, %v2349_v47  ;;  %vm2911_vm0 = vmpackc.low %vm3442_vm11, %vm3441_vm8  ;;  %vm3445_vm2 = vcmp.eq.s32.totalorder %v2508_v61, %v2433_v44  ;;  %vm287_vm8 = vcmp.eq.s32.totalorder %v161_v28, %v2431_v43  ;;  %vm291_vm11 = vcmp.eq.s32.totalorder %v162_v29, %v2431_v43 }
  0x62   :  { %1822 = vmatmul.mubr.msk.bf16.gmra.mrb[16].mxu1 %vm2811_vm7, %v2349_v47  ;;  %1760 = vmatprep.mubr.msk.bf16.mxu0 %vm2829_vm3, %v2349_v47  ;;  %v3444_v31 = vsel %vm2911_vm0, 4294967295, %v3443_v31  ;;  %vm3446_vm7 = vcmp.eq.s32.totalorder %v2515_v63, %v2433_v44  ;;  %vm3453_vm0 = vcmp.eq.s32.totalorder %v2508_v61, %v2437_v46  ;;  %vm2960_vm15 = vmpackc.low %vm282_vm10, %vm278_vm4  ;;  %vm3468_vm4 = vcmp.eq.s32.totalorder %v2521_v1, %v2433_v44 }
  0x63   :  { %1824 = vmatprep.mubr.msk.bf16.mxu1 %vm2847_vm5, %v2349_v47  ;;  %vm2928_vm3 = vmpackc.low %vm3446_vm7, %vm3445_vm2  ;;  %vm284_vm5 = vcmp.eq.s32.totalorder %v2505_v60, %v2437_v46  ;;  %vm289_vm7 = vcmp.eq.s32.totalorder %v161_v28, %v2433_v44  ;;  %v3458_v35 = vsel %vm2960_vm15, 4294967295, %v3457_v35  ;;  %v3524_v60 = vmov 0 }
  0x64   :  { %v3448_v32 = vsel %vm2928_vm3, 4294967295, %v3447_v32  ;;  %vm2944_vm2 = vmpackc.low %vm3450_vm1, %vm3449_vm13  ;;  %vm293_vm3 = vcmp.eq.s32.totalorder %v162_v29, %v2433_v44  ;;  %vm3459_vm13 = vcmp.eq.s32.totalorder %v2518_v0, %v2431_v43  ;;  %vm3460_vm1 = vcmp.eq.s32.totalorder %v2521_v1, %v2431_v43 }
  0x65   :  { %v3452_v33 = vsel %vm2944_vm2, 4294967295, %v3451_v33  ;;  %vm2956_vm6 = vmpackc.low %vm3454_vm9, %vm3453_vm0  ;;  %vm3467_vm0 = vcmp.eq.s32.totalorder %v2518_v0, %v2433_v44  ;;  %v3530_v61 = vmov 0  ;;  %v3539_v63 = vmov 0 }
  0x66   :  { %v3456_v34 = vsel %vm2956_vm6, 4294967295, %v3455_v34  ;;  %vm2970_vm2 = vmpackc.low %vm3460_vm1, %vm3459_vm13 }
  0x67   :  { %v3462_v36 = vsel %vm2970_vm2, 4294967295, %v3461_v36  ;;  %vm2974_vm12 = vmpackc.low %vm284_vm5, %vm280_vm14  ;;  %vm3473_vm14 = vcmp.eq.s32.totalorder %v2518_v0, %v2435_v45  ;;  %vm3474_vm5 = vcmp.eq.s32.totalorder %v2521_v1, %v2435_v45  ;;  %vm3494_vm2 = vcmp.eq.s32.totalorder %v2530_v3, %v2435_v45 }
  0x68   :  { %v3464_v37 = vsel %vm2974_vm12, 4294967295, %v3463_v37  ;;  %vm2978_vm9 = vmpackc.low %vm291_vm11, %vm287_vm8  ;;  %vm3478_vm11 = vcmp.eq.s32.totalorder %v2518_v0, %v2437_v46  ;;  %v3543_v0 = vmov 0 }
  0x69   :  { %v3466_v38 = vsel %vm2978_vm9, 4294967295, %v3465_v38  ;;  %vm2988_vm10 = vmpackc.low %vm3468_vm4, %vm3467_vm0  ;;  %vm3482_vm0 = vnez %v3435_v26  ;;  %vm3483_vm4 = vnez %v3438_v27 }
  0x6a   :  { %v3470_v39 = vsel %vm2988_vm10, 4294967295, %v3469_v39  ;;  %vm2992_vm13 = vmpackc.low %vm293_vm3, %vm289_vm7  ;;  %vm3477_vm3 = vnez %v3431_v24  ;;  %vm3479_vm7 = vcmp.eq.s32.totalorder %v2521_v1, %v2437_v46  ;;  %1826 = vmatmul.mubr.msk.bf16.gmra.mrb[20].mxu1 %vm3482_vm0, %v2349_v47  ;;  %vm290_vm0 = vcmp.eq.s32.totalorder %v162_v29, %v2435_v45 }
  0x6b   :  { %v3472_v40 = vsel %vm2992_vm13, 4294967295, %v3471_v40  ;;  %vm3004_vm8 = vmpackc.low %vm3474_vm5, %vm3473_vm14  ;;  %1762 = vmatmul.mubr.msk.bf16.gmra.mrb[20].mxu0 %vm3477_vm3, %v2349_v47  ;;  %vm3484_vm14 = vcmp.eq.s32.totalorder %v2524_v2, %v2431_v43  ;;  %vm3485_vm5 = vcmp.eq.s32.totalorder %v2530_v3, %v2431_v43  ;;  %vm3493_vm10 = vcmp.eq.s32.totalorder %v2524_v2, %v2435_v45 }
  0x6c   :  { %v3476_v48 = vsel %vm3004_vm8, 4294967295, %v3475_v48  ;;  %vm3017_vm1 = vmpackc.low %vm3479_vm7, %vm3478_vm11  ;;  %1764 = vmatprep.mubr.msk.bf16.mxu0 %vm3483_vm4, %v2349_v47  ;;  %vm3488_vm11 = vnez %v3440_v30  ;;  %vm286_vm7 = vcmp.eq.s32.totalorder %v161_v28, %v2435_v45  ;;  %vm3489_vm4 = vcmp.eq.s32.totalorder %v2524_v2, %v2433_v44 }
  0x6d   :  { %v3481_v25 = vsel %vm3017_vm1, 4294967295, %v3480_v25  ;;  %vm3033_vm3 = vmpackc.low %vm3485_vm5, %vm3484_vm14  ;;  %1828 = vmatprep.mubr.msk.bf16.mxu1 %vm3488_vm11, %v2349_v47  ;;  %vm3490_vm1 = vcmp.eq.s32.totalorder %v2530_v3, %v2433_v44  ;;  %vm288_vm14 = vcmp.eq.s32.totalorder %v161_v28, %v2437_v46  ;;  %vm292_vm5 = vcmp.eq.s32.totalorder %v162_v29, %v2437_v46 }
  0x6e   :  { %v3487_v49 = vsel %vm3033_vm3, 4294967295, %v3486_v49  ;;  %vm3048_vm8 = vmpackc.low %vm3490_vm1, %vm3489_vm4  ;;  %vm295_vm11 = vcmp.eq.s32.totalorder %v163_v41, %v2431_v43  ;;  %vm299_vm3 = vcmp.eq.s32.totalorder %v164_v42, %v2431_v43  ;;  %vm297_vm1 = vcmp.eq.s32.totalorder %v163_v41, %v2433_v44 }
  0x6f   :  { %v3492_v50 = vsel %vm3048_vm8, 4294967295, %v3491_v50  ;;  %vm3062_vm6 = vmpackc.low %vm3494_vm2, %vm3493_vm10  ;;  %vm301_vm4 = vcmp.eq.s32.totalorder %v164_v42, %v2433_v44  ;;  %vm3497_vm8 = vcmp.eq.s32.totalorder %v2524_v2, %v2437_v46  ;;  %vm3498_vm13 = vcmp.eq.s32.totalorder %v2530_v3, %v2437_v46 }
  0x70   :  { %v3496_v51 = vsel %vm3062_vm6, 4294967295, %v3495_v51  ;;  %vm3074_vm9 = vmpackc.low %vm3498_vm13, %vm3497_vm8  ;;  %vm3503_vm2 = vcmp.eq.s32.totalorder %v2533_v4, %v2431_v43  ;;  %vm3504_vm10 = vcmp.eq.s32.totalorder %v2536_v5, %v2431_v43  ;;  %vm3511_vm8 = vcmp.eq.s32.totalorder %v2533_v4, %v2433_v44 }
  0x71   :  { %vm3078_vm12 = vmpackc.low %vm290_vm0, %vm286_vm7  ;;  %vm3512_vm7 = vcmp.eq.s32.totalorder %v2536_v5, %v2433_v44  ;;  %v3547_v1 = vmov 0  ;;  %v3551_v2 = vmov 0  ;;  %v3555_v3 = vmov 0 }
  0x72   :  { %vm3088_vm6 = vmpackc.low %vm3504_vm10, %vm3503_vm2 }
  0x73   :  { %vm3092_vm15 = vmpackc.low %vm292_vm5, %vm288_vm14  ;;  %vm3518_vm14 = vcmp.eq.s32.totalorder %v2536_v5, %v2435_v45 }
  0x74   :  { %vm3096_vm13 = vmpackc.low %vm299_vm3, %vm295_vm11  ;;  %vm3517_vm3 = vcmp.eq.s32.totalorder %v2533_v4, %v2435_v45  ;;  %vm3521_vm11 = vnez %v3458_v35 }
  0x75   :  { %vm3106_vm0 = vmpackc.low %vm3512_vm7, %vm3511_vm8  ;;  %1766 = vmatmul.mubr.msk.bf16.gmra.mrb[24].mxu0 %vm3521_vm11, %v2349_v47  ;;  %vm3526_vm8 = vnez %v3464_v37  ;;  %vm3527_vm7 = vnez %v3466_v38  ;;  %v681_v37 = vld [vmem:[#allocation2 + $0x18] sm:$0xff] }
  0x76   :  { %vm3110_vm2 = vmpackc.low %vm301_vm4, %vm297_vm1  ;;  %vm3522_vm1 = vcmp.eq.s32.totalorder %v2533_v4, %v2437_v46  ;;  %vm3523_vm4 = vcmp.eq.s32.totalorder %v2536_v5, %v2437_v46  ;;  %1830 = vmatmul.mubr.msk.bf16.gmra.mrb[24].mxu1 %vm3526_vm8, %v2349_v47  ;;  %1768 = vmatprep.mubr.msk.bf16.mxu0 %vm3527_vm7, %v2349_v47  ;;  %vm3534_vm8 = vcmp.eq.s32.totalorder %v2550_v7, %v2433_v44  ;;  %v3559_v4 = vmov 0 }
  0x77   :  { %vm3120_vm5 = vmpackc.low %vm3518_vm14, %vm3517_vm3  ;;  %vm3528_vm3 = vcmp.eq.s32.totalorder %v2539_v6, %v2431_v43  ;;  %vm3529_vm14 = vcmp.eq.s32.totalorder %v2550_v7, %v2431_v43  ;;  %v3563_v5 = vmov 0 }
  0x78   :  { %vm3133_vm10 = vmpackc.low %vm3523_vm4, %vm3522_vm1  ;;  %vm3532_vm1 = vnez %v3472_v40  ;;  %vm3533_vm4 = vcmp.eq.s32.totalorder %v2539_v6, %v2433_v44 }
  0x79   :  { %v3525_v60 = vsel %vm3133_vm10, 4294967295, %v3524_v60  ;;  %vm3149_vm11 = vmpackc.low %vm3529_vm14, %vm3528_vm3  ;;  %1832 = vmatprep.mubr.msk.bf16.mxu1 %vm3532_vm1, %v2349_v47  ;;  %vm3537_vm3 = vcmp.eq.s32.totalorder %v2539_v6, %v2435_v45  ;;  %vm3538_vm14 = vcmp.eq.s32.totalorder %v2550_v7, %v2435_v45  ;;  %vm3541_vm1 = vcmp.eq.s32.totalorder %v2539_v6, %v2437_v46 }
  0x7a   :  { %v3531_v61 = vsel %vm3149_vm11, 4294967295, %v3530_v61  ;;  %vm3162_vm7 = vmpackc.low %vm3534_vm8, %vm3533_vm4  ;;  %vm3542_vm10 = vcmp.eq.s32.totalorder %v2550_v7, %v2437_v46  ;;  %vm3545_vm8 = vcmp.eq.s32.totalorder %v2553_v8, %v2431_v43 }
  0x7b   :  { %v3536_v62 = vsel %vm3162_vm7, 4294967295, %v3535_v62  ;;  %vm3172_vm11 = vmpackc.low %vm3538_vm14, %vm3537_vm3  ;;  %vm3546_vm7 = vcmp.eq.s32.totalorder %v2561_v9, %v2431_v43  ;;  %vm3549_vm14 = vcmp.eq.s32.totalorder %v2553_v8, %v2433_v44 }
  0x7c   :  { %v3540_v63 = vsel %vm3172_vm11, 4294967295, %v3539_v63  ;;  %vm3182_vm4 = vmpackc.low %vm3542_vm10, %vm3541_vm1  ;;  %vm3550_vm11 = vcmp.eq.s32.totalorder %v2561_v9, %v2433_v44  ;;  %vm3553_vm1 = vcmp.eq.s32.totalorder %v2553_v8, %v2435_v45 }
  0x7d   :  { %v3544_v0 = vsel %vm3182_vm4, 4294967295, %v3543_v0  ;;  %vm3192_vm3 = vmpackc.low %vm3546_vm7, %vm3545_vm8  ;;  %vm3554_vm4 = vcmp.eq.s32.totalorder %v2561_v9, %v2435_v45  ;;  %1770 = vmatmul.mubr.msk.bf16.gmra.mrb[28].mxu0 %vm3078_vm12, %v2349_v47  ;;  %vm3558_vm8 = vcmp.eq.s32.totalorder %v2561_v9, %v2437_v46  ;;  %vm3561_vm12 = vcmp.eq.s32.totalorder %v2564_v10, %v2431_v43 }
  0x7e   :  { %v3548_v1 = vsel %vm3192_vm3, 4294967295, %v3547_v1  ;;  %vm3202_vm10 = vmpackc.low %vm3550_vm11, %vm3549_vm14  ;;  %vm3557_vm11 = vcmp.eq.s32.totalorder %v2553_v8, %v2437_v46  ;;  %1834 = vmatmul.mubr.msk.bf16.gmra.mrb[28].mxu1 %vm3092_vm15, %v2349_v47  ;;  %1772 = vmatprep.mubr.msk.bf16.mxu0 %vm3096_vm13, %v2349_v47  ;;  %vm294_vm15 = vcmp.eq.s32.totalorder %v163_v41, %v2435_v45  ;;  %vm3565_vm13 = vcmp.eq.s32.totalorder %v2564_v10, %v2433_v44 }
  0x7f   :  { %v3552_v2 = vsel %vm3202_vm10, 4294967295, %v3551_v2  ;;  %vm3212_vm7 = vmpackc.low %vm3554_vm4, %vm3553_vm1  ;;  %vm3562_vm4 = vcmp.eq.s32.totalorder %v2666_v15, %v2431_v43  ;;  %1836 = vmatprep.mubr.msk.bf16.mxu1 %vm3110_vm2, %v2349_v47  ;;  %v3567_v43 = vmov 0  ;;  %vm3569_vm2 = vcmp.eq.s32.totalorder %v2564_v10, %v2435_v45 }
  0x80   :  { %v3556_v3 = vsel %vm3212_vm7, 4294967295, %v3555_v3  ;;  %vm3225_vm14 = vmpackc.low %vm3558_vm8, %vm3557_vm11  ;;  %vm298_vm11 = vcmp.eq.s32.totalorder %v164_v42, %v2435_v45  ;;  %vm3566_vm8 = vcmp.eq.s32.totalorder %v2666_v15, %v2433_v44  ;;  %v684_v44 = vld [vmem:[#allocation2 + $0x30] sm:$0xff] }
  0x81   :  { %v3560_v4 = vsel %vm3225_vm14, 4294967295, %v3559_v4  ;;  %vm3241_vm1 = vmpackc.low %vm3562_vm4, %vm3561_vm12  ;;  %vm296_vm12 = vcmp.eq.s32.totalorder %v163_v41, %v2437_v46  ;;  %vm300_vm4 = vcmp.eq.s32.totalorder %v164_v42, %v2437_v46 }
  0x82   :  { %v3564_v5 = vsel %vm3241_vm1, 4294967295, %v3563_v5  ;;  %vm3256_vm14 = vmpackc.low %vm3566_vm8, %vm3565_vm13  ;;  %vm3570_vm1 = vcmp.eq.s32.totalorder %v2666_v15, %v2435_v45  ;;  %vm3573_vm13 = vcmp.eq.s32.totalorder %v2564_v10, %v2437_v46  ;;  %vm3574_vm8 = vcmp.eq.s32.totalorder %v2666_v15, %v2437_v46 }
  0x83   :  { %v3568_v43 = vsel %vm3256_vm14, 4294967295, %v3567_v43  ;;  %vm3268_vm7 = vmpackc.low %vm3570_vm1, %vm3569_vm2  ;;  %vm3577_vm1 = vnez %v3444_v31  ;;  %vm3578_vm2 = vnez %v3448_v32  ;;  %v680_v32 = vld [vmem:[#allocation2 + $0x10] sm:$0xff] }
  0x84   :  { %vm3278_vm14 = vmpackc.low %vm3574_vm8, %vm3573_vm13  ;;  %vm3579_vm13 = vnez %v3452_v33  ;;  %vm3586_vm8 = vnez %v3492_v50 }
  0x85   :  { %vm1773_vm10 = vmpackc.low %vm298_vm11, %vm294_vm15  ;;  %vm3580_vm15 = vnez %v3456_v34  ;;  %vm3583_vm11 = vnez %v3476_v48 }
  0x86   :  { %vm1837_vm3 = vmpackc.low %vm300_vm4, %vm296_vm12  ;;  %1774 = vmatmul.mubr.msk.bf16.gmra.mrb[32].mxu0 %vm1773_vm10, %v2349_v47  ;;  %vm3581_vm10 = vnez %v3462_v36  ;;  %vm3584_vm12 = vnez %v3481_v25  ;;  %vm3585_vm4 = vnez %v3487_v49 }
  0x87   :  { %1838 = vmatmul.mubr.msk.bf16.gmra.mrb[32].mxu1 %vm1837_vm3, %v2349_v47  ;;  %1776 = vmatprep.mubr.msk.bf16.mxu0 %vm3577_vm1, %v2349_v47  ;;  %vm3582_vm3 = vnez %v3470_v39  ;;  %vm3587_vm1 = vnez %v3496_v51 }
  0x88   :  { %1840 = vmatprep.mubr.msk.bf16.mxu1 %vm3578_vm2, %v2349_v47  ;;  %vm3588_vm2 = vnez %v3525_v60 }
  0x8e   :  { %1778 = vmatmul.mubr.msk.bf16.gmra.mrb[36].mxu0 %vm3579_vm13, %v2349_v47  ;;  %vm3589_vm13 = vnez %v3531_v61 }
  0x8f   :  { %1842 = vmatmul.mubr.msk.bf16.gmra.mrb[36].mxu1 %vm3580_vm15, %v2349_v47  ;;  %1780 = vmatprep.mubr.msk.bf16.mxu0 %vm3581_vm10, %v2349_v47  ;;  %vm3594_vm15 = vnez %v3552_v2  ;;  %vm3595_vm10 = vnez %v3556_v3 }
  0x90   :  { %1844 = vmatprep.mubr.msk.bf16.mxu1 %vm3582_vm3, %v2349_v47  ;;  %vm3596_vm3 = vnez %v3560_v4 }
  0x96   :  { %1782 = vmatmul.mubr.msk.bf16.gmra.mrb[40].mxu0 %vm3583_vm11, %v2349_v47  ;;  %vm3597_vm11 = vnez %v3564_v5 }
  0x97   :  { %1846 = vmatmul.mubr.msk.bf16.gmra.mrb[40].mxu1 %vm3584_vm12, %v2349_v47  ;;  %1784 = vmatprep.mubr.msk.bf16.mxu0 %vm3585_vm4, %v2349_v47  ;;  %vm3598_vm12 = vnez %v3568_v43 }
  0x98   :  { %1848 = vmatprep.mubr.msk.bf16.mxu1 %vm3586_vm8, %v2349_v47 }
  0x9e   :  { %1786 = vmatmul.mubr.msk.bf16.gmra.mrb[44].mxu0 %vm3587_vm1, %v2349_v47 }
  0x9f   :  { %1850 = vmatmul.mubr.msk.bf16.gmra.mrb[44].mxu1 %vm3074_vm9, %v2349_v47  ;;  %1788 = vmatprep.mubr.msk.bf16.mxu0 %vm3088_vm6, %v2349_v47  ;;  %vm3590_vm9 = vnez %v3536_v62  ;;  %vm3591_vm6 = vnez %v3540_v63 }
  0xa0   :  { %1852 = vmatprep.mubr.msk.bf16.mxu1 %vm3106_vm0, %v2349_v47  ;;  %vm3592_vm0 = vnez %v3544_v0 }
  0xa6   :  { %1790 = vmatmul.mubr.msk.bf16.gmra.mrb[48].mxu0 %vm3120_vm5, %v2349_v47  ;;  %vm3593_vm5 = vnez %v3548_v1 }
  0xa7   :  { %1854 = vmatmul.mubr.msk.bf16.gmra.mrb[48].mxu1 %vm3588_vm2, %v2349_v47  ;;  %1792 = vmatprep.mubr.msk.bf16.mxu0 %vm3589_vm13, %v2349_v47 }
  0xa8   :  { %1856 = vmatprep.mubr.msk.bf16.mxu1 %vm3590_vm9, %v2349_v47 }
  0xae   :  { %1794 = vmatmul.mubr.msk.bf16.gmra.mrb[52].mxu0 %vm3591_vm6, %v2349_v47 }
  0xaf   :  { %1858 = vmatmul.mubr.msk.bf16.gmra.mrb[52].mxu1 %vm3592_vm0, %v2349_v47  ;;  %1796 = vmatprep.mubr.msk.bf16.mxu0 %vm3593_vm5, %v2349_v47 }
  0xb0   :  { %1860 = vmatprep.mubr.msk.bf16.mxu1 %vm3594_vm15, %v2349_v47 }
  0xb6   :  { %1798 = vmatmul.mubr.msk.bf16.gmra.mrb[56].mxu0 %vm3595_vm10, %v2349_v47 }
  0xb7   :  { %1862 = vmatmul.mubr.msk.bf16.gmra.mrb[56].mxu1 %vm3596_vm3, %v2349_v47  ;;  %1800 = vmatprep.mubr.msk.bf16.mxu0 %vm3597_vm11, %v2349_v47 }
  0xb8   :  { %1864 = vmatprep.mubr.msk.bf16.mxu1 %vm3598_vm12, %v2349_v47 }
  0xbe   :  { %1802 = vmatmul.mubr.msk.bf16.gmra.mrb[60].mxu0 %vm3268_vm7, %v2349_v47 }
  0xbf   :  { %1866 = vmatmul.mubr.msk.bf16.gmra.mrb[60].mxu1 %vm3278_vm14, %v2349_v47 }
 0x114   :  { %v2049_v45 = vpop.f32.mrb[0].mxu0 }
 0x115   :  { %v2161_v46 = vpop.f32.mrb[0].mxu1  ;;  %v2050_v7 = vpop.f32.mrb[1].mxu0 }
 0x116   :  { %v2051_v8 = vadd.f32 %v2050_v7, %v2049_v45  ;;  %v2162_v9 = vpop.f32.mrb[1].mxu1  ;;  %v2052_v10 = vpop.f32.mrb[2].mxu0 }
 0x117   :  { %v2163_v11 = vadd.f32 %v2162_v9, %v2161_v46  ;;  %v2164_v12 = vpop.f32.mrb[2].mxu1  ;;  %v2053_v13 = vpop.f32.mrb[3].mxu0  ;;  %v685_v9 = vld [vmem:[#allocation2 + $0x38] sm:$0xff] }
 0x118   :  { %v2054_v15 = vadd.f32 %v2053_v13, %v2052_v10  ;;  %v2165_v16 = vpop.f32.mrb[3].mxu1 }
 0x119   :  { %v1162_v17 = vadd.f32 %v2163_v11, %v2051_v8  ;;  %v2166_v18 = vadd.f32 %v2165_v16, %v2164_v12 }
 0x11b   :  { %v1288_v20 = vadd.f32 %v1162_v17, %v678_v14  ;;  %v1165_v21 = vadd.f32 %v2166_v18, %v2054_v15 }
 0x11c   :  { %v2055_v22 = vpop.f32.mrb[4].mxu0 }
 0x11d   :  { %1320 = vst [vmem:[#allocation2] sm:$0xff] %v1288_v20  ;;  %v1289_v47 = vadd.f32 %v1165_v21, %v679_v19  ;;  %v2167_v23 = vpop.f32.mrb[4].mxu1  ;;  %v2056_v24 = vpop.f32.mrb[5].mxu0 }
 0x11e   :  { %v2057_v26 = vadd.f32 %v2056_v24, %v2055_v22  ;;  %v2168_v27 = vpop.f32.mrb[5].mxu1  ;;  %v2058_v28 = vpop.f32.mrb[6].mxu0  ;;  %v686_v22 = vld [vmem:[#allocation2 + $0x40] sm:$0xff] }
 0x11f   :  { %1321 = vst [vmem:[#allocation2 + $0x8] sm:$0xff] %v1289_v47  ;;  %v2169_v29 = vadd.f32 %v2168_v27, %v2167_v23  ;;  %v2170_v30 = vpop.f32.mrb[6].mxu1  ;;  %v2059_v31 = vpop.f32.mrb[7].mxu0  ;;  %v687_v27 = vld [vmem:[#allocation2 + $0x48] sm:$0xff] }
 0x120   :  { %v2060_v33 = vadd.f32 %v2059_v31, %v2058_v28  ;;  %v2171_v34 = vpop.f32.mrb[7].mxu1 }
 0x121   :  { %v1170_v35 = vadd.f32 %v2169_v29, %v2057_v26  ;;  %v2172_v36 = vadd.f32 %v2171_v34, %v2170_v30 }
 0x123   :  { %v1290_v38 = vadd.f32 %v1170_v35, %v680_v32  ;;  %v1173_v39 = vadd.f32 %v2172_v36, %v2060_v33 }
 0x124   :  { %v2061_v40 = vpop.f32.mrb[8].mxu0 }
 0x125   :  { %1322 = vst [vmem:[#allocation2 + $0x10] sm:$0xff] %v1290_v38  ;;  %v1291_v41 = vadd.f32 %v1173_v39, %v681_v37  ;;  %v2173_v42 = vpop.f32.mrb[8].mxu1  ;;  %v2062_v48 = vpop.f32.mrb[9].mxu0 }
 0x126   :  { %v2063_v25 = vadd.f32 %v2062_v48, %v2061_v40  ;;  %v2174_v49 = vpop.f32.mrb[9].mxu1  ;;  %v2064_v50 = vpop.f32.mrb[10].mxu0  ;;  %v688_v40 = vld [vmem:[#allocation2 + $0x50] sm:$0xff] }
 0x127   :  { %1323 = vst [vmem:[#allocation2 + $0x18] sm:$0xff] %v1291_v41  ;;  %v2175_v51 = vadd.f32 %v2174_v49, %v2173_v42  ;;  %v2176_v52 = vpop.f32.mrb[10].mxu1  ;;  %v2065_v53 = vpop.f32.mrb[11].mxu0  ;;  %v689_v49 = vld [vmem:[#allocation2 + $0x58] sm:$0xff] }
 0x128   :  { %v2066_v55 = vadd.f32 %v2065_v53, %v2064_v50  ;;  %v2177_v56 = vpop.f32.mrb[11].mxu1 }
 0x129   :  { %v1178_v57 = vadd.f32 %v2175_v51, %v2063_v25  ;;  %v2178_v58 = vadd.f32 %v2177_v56, %v2176_v52 }
 0x12b   :  { %v1292_v60 = vadd.f32 %v1178_v57, %v682_v54  ;;  %v1181_v61 = vadd.f32 %v2178_v58, %v2066_v55 }
 0x12c   :  { %v2067_v62 = vpop.f32.mrb[12].mxu0 }
 0x12d   :  { %1324 = vst [vmem:[#allocation2 + $0x20] sm:$0xff] %v1292_v60  ;;  %v1293_v63 = vadd.f32 %v1181_v61, %v683_v59  ;;  %v2179_v0 = vpop.f32.mrb[12].mxu1  ;;  %v2068_v1 = vpop.f32.mrb[13].mxu0 }
 0x12e   :  { %v2069_v2 = vadd.f32 %v2068_v1, %v2067_v62  ;;  %v2180_v3 = vpop.f32.mrb[13].mxu1  ;;  %v2070_v4 = vpop.f32.mrb[14].mxu0  ;;  %v690_v62 = vld [vmem:[#allocation2 + $0x60] sm:$0xff] }
 0x12f   :  { %1325 = vst [vmem:[#allocation2 + $0x28] sm:$0xff] %v1293_v63  ;;  %v2181_v5 = vadd.f32 %v2180_v3, %v2179_v0  ;;  %v2182_v43 = vpop.f32.mrb[14].mxu1  ;;  %v2071_v6 = vpop.f32.mrb[15].mxu0  ;;  %v691_v3 = vld [vmem:[#allocation2 + $0x68] sm:$0xff] }
 0x130   :  { %v2072_v45 = vadd.f32 %v2071_v6, %v2070_v4  ;;  %v2183_v46 = vpop.f32.mrb[15].mxu1 }
 0x131   :  { %v1186_v7 = vadd.f32 %v2181_v5, %v2069_v2  ;;  %v2184_v8 = vadd.f32 %v2183_v46, %v2182_v43 }
 0x133   :  { %v1294_v10 = vadd.f32 %v1186_v7, %v684_v44  ;;  %v1189_v11 = vadd.f32 %v2184_v8, %v2072_v45 }
 0x134   :  { %v2073_v12 = vpop.f32.mrb[16].mxu0 }
 0x135   :  { %1326 = vst [vmem:[#allocation2 + $0x30] sm:$0xff] %v1294_v10  ;;  %v1295_v13 = vadd.f32 %v1189_v11, %v685_v9  ;;  %v2185_v14 = vpop.f32.mrb[16].mxu1  ;;  %v2074_v15 = vpop.f32.mrb[17].mxu0 }
 0x136   :  { %v2075_v16 = vadd.f32 %v2074_v15, %v2073_v12  ;;  %v2186_v17 = vpop.f32.mrb[17].mxu1  ;;  %v2076_v18 = vpop.f32.mrb[18].mxu0  ;;  %v692_v12 = vld [vmem:[#allocation2 + $0x70] sm:$0xff] }
 0x137   :  { %1327 = vst [vmem:[#allocation2 + $0x38] sm:$0xff] %v1295_v13  ;;  %v2187_v19 = vadd.f32 %v2186_v17, %v2185_v14  ;;  %v2188_v20 = vpop.f32.mrb[18].mxu1  ;;  %v2077_v21 = vpop.f32.mrb[19].mxu0  ;;  %v693_v17 = vld [vmem:[#allocation2 + $0x78] sm:$0xff] }
 0x138   :  { %v2078_v47 = vadd.f32 %v2077_v21, %v2076_v18  ;;  %v2189_v23 = vpop.f32.mrb[19].mxu1 }
 0x139   :  { %v1194_v24 = vadd.f32 %v2187_v19, %v2075_v16  ;;  %v2190_v26 = vadd.f32 %v2189_v23, %v2188_v20 }
 0x13b   :  { %v1296_v28 = vadd.f32 %v1194_v24, %v686_v22  ;;  %v1197_v29 = vadd.f32 %v2190_v26, %v2078_v47 }
 0x13d   :  { %1328 = vst [vmem:[#allocation2 + $0x40] sm:$0xff] %v1296_v28  ;;  %v1297_v31 = vadd.f32 %v1197_v29, %v687_v27  ;;  %v2191_v32 = vpop.f32.mrb[20].mxu1 }
 0x13e   :  { %v2079_v30 = vpop.f32.mrb[20].mxu0  ;;  %v2192_v35 = vpop.f32.mrb[21].mxu1 }
 0x13f   :  { %v2080_v33 = vpop.f32.mrb[21].mxu0  ;;  %1329 = vst [vmem:[#allocation2 + $0x48] sm:$0xff] %v1297_v31  ;;  %v2193_v37 = vadd.f32 %v2192_v35, %v2191_v32  ;;  %v2194_v38 = vpop.f32.mrb[22].mxu1  ;;  %v695_v35 = vld [vmem:[#allocation2 + $0x88] sm:$0xff] }
 0x140   :  { %v2081_v34 = vadd.f32 %v2080_v33, %v2079_v30  ;;  %v2082_v36 = vpop.f32.mrb[22].mxu0  ;;  %v2195_v42 = vpop.f32.mrb[23].mxu1  ;;  %v694_v30 = vld [vmem:[#allocation2 + $0x80] sm:$0xff] }
 0x141   :  { %v2083_v39 = vpop.f32.mrb[23].mxu0  ;;  %v2196_v25 = vadd.f32 %v2195_v42, %v2194_v38 }
 0x142   :  { %v2084_v41 = vadd.f32 %v2083_v39, %v2082_v36  ;;  %v1202_v48 = vadd.f32 %v2193_v37, %v2081_v34 }
 0x144   :  { %v1298_v50 = vadd.f32 %v1202_v48, %v688_v40  ;;  %v1205_v51 = vadd.f32 %v2196_v25, %v2084_v41 }
 0x146   :  { %1330 = vst [vmem:[#allocation2 + $0x50] sm:$0xff] %v1298_v50  ;;  %v1299_v53 = vadd.f32 %v1205_v51, %v689_v49 }
 0x148   :  { %v2085_v52 = vpop.f32.mrb[24].mxu0  ;;  %1331 = vst [vmem:[#allocation2 + $0x58] sm:$0xff] %v1299_v53 }
 0x149   :  { %v2197_v54 = vpop.f32.mrb[24].mxu1  ;;  %v2086_v55 = vpop.f32.mrb[25].mxu0 }
 0x14a   :  { %v2087_v56 = vadd.f32 %v2086_v55, %v2085_v52  ;;  %v2198_v57 = vpop.f32.mrb[25].mxu1  ;;  %v2088_v58 = vpop.f32.mrb[26].mxu0  ;;  %v696_v52 = vld [vmem:[#allocation2 + $0x90] sm:$0xff] }
 0x14b   :  { %v2199_v59 = vadd.f32 %v2198_v57, %v2197_v54  ;;  %v2200_v60 = vpop.f32.mrb[26].mxu1  ;;  %v2089_v61 = vpop.f32.mrb[27].mxu0  ;;  %v697_v57 = vld [vmem:[#allocation2 + $0x98] sm:$0xff] }
 0x14c   :  { %v2090_v63 = vadd.f32 %v2089_v61, %v2088_v58  ;;  %v2201_v0 = vpop.f32.mrb[27].mxu1 }
 0x14d   :  { %v1210_v1 = vadd.f32 %v2199_v59, %v2087_v56  ;;  %v2202_v2 = vadd.f32 %v2201_v0, %v2200_v60 }
 0x14f   :  { %v1300_v4 = vadd.f32 %v1210_v1, %v690_v62  ;;  %v1213_v5 = vadd.f32 %v2202_v2, %v2090_v63 }
 0x150   :  { %v2091_v43 = vpop.f32.mrb[28].mxu0 }
 0x151   :  { %1332 = vst [vmem:[#allocation2 + $0x60] sm:$0xff] %v1300_v4  ;;  %v1301_v6 = vadd.f32 %v1213_v5, %v691_v3  ;;  %v2203_v44 = vpop.f32.mrb[28].mxu1  ;;  %v2092_v45 = vpop.f32.mrb[29].mxu0 }
 0x152   :  { %v2093_v46 = vadd.f32 %v2092_v45, %v2091_v43  ;;  %v2204_v7 = vpop.f32.mrb[29].mxu1  ;;  %v2094_v8 = vpop.f32.mrb[30].mxu0  ;;  %v698_v43 = vld [vmem:[#allocation2 + $0xa0] sm:$0xff] }
 0x153   :  { %1333 = vst [vmem:[#allocation2 + $0x68] sm:$0xff] %v1301_v6  ;;  %v2205_v9 = vadd.f32 %v2204_v7, %v2203_v44  ;;  %v2206_v10 = vpop.f32.mrb[30].mxu1  ;;  %v2095_v11 = vpop.f32.mrb[31].mxu0  ;;  %v699_v7 = vld [vmem:[#allocation2 + $0xa8] sm:$0xff] }
 0x154   :  { %v2096_v13 = vadd.f32 %v2095_v11, %v2094_v8  ;;  %v2207_v14 = vpop.f32.mrb[31].mxu1 }
 0x155   :  { %v1218_v15 = vadd.f32 %v2205_v9, %v2093_v46  ;;  %v2208_v16 = vadd.f32 %v2207_v14, %v2206_v10 }
 0x157   :  { %v1302_v18 = vadd.f32 %v1218_v15, %v692_v12  ;;  %v1221_v19 = vadd.f32 %v2208_v16, %v2096_v13 }
 0x159   :  { %v2097_v20 = vpop.f32.mrb[32].mxu0  ;;  %1334 = vst [vmem:[#allocation2 + $0x70] sm:$0xff] %v1302_v18  ;;  %v1303_v21 = vadd.f32 %v1221_v19, %v693_v17 }
 0x15a   :  { %v2209_v22 = vpop.f32.mrb[32].mxu1  ;;  %v2098_v47 = vpop.f32.mrb[33].mxu0 }
 0x15b   :  { %v2099_v23 = vadd.f32 %v2098_v47, %v2097_v20  ;;  %v2210_v24 = vpop.f32.mrb[33].mxu1  ;;  %v2100_v26 = vpop.f32.mrb[34].mxu0  ;;  %1335 = vst [vmem:[#allocation2 + $0x78] sm:$0xff] %v1303_v21  ;;  %v700_v20 = vld [vmem:[#allocation2 + $0xb0] sm:$0xff] }
 0x15c   :  { %v2211_v27 = vadd.f32 %v2210_v24, %v2209_v22  ;;  %v2212_v28 = vpop.f32.mrb[34].mxu1  ;;  %v2101_v29 = vpop.f32.mrb[35].mxu0  ;;  %v701_v24 = vld [vmem:[#allocation2 + $0xb8] sm:$0xff] }
 0x15d   :  { %v2102_v31 = vadd.f32 %v2101_v29, %v2100_v26  ;;  %v2213_v32 = vpop.f32.mrb[35].mxu1 }
 0x15e   :  { %v1226_v33 = vadd.f32 %v2211_v27, %v2099_v23  ;;  %v2214_v34 = vadd.f32 %v2213_v32, %v2212_v28 }
 0x160   :  { %v1304_v36 = vadd.f32 %v1226_v33, %v694_v30  ;;  %v1229_v37 = vadd.f32 %v2214_v34, %v2102_v31 }
 0x161   :  { %v2103_v38 = vpop.f32.mrb[36].mxu0 }
 0x162   :  { %1336 = vst [vmem:[#allocation2 + $0x80] sm:$0xff] %v1304_v36  ;;  %v1305_v39 = vadd.f32 %v1229_v37, %v695_v35  ;;  %v2215_v40 = vpop.f32.mrb[36].mxu1  ;;  %v2104_v41 = vpop.f32.mrb[37].mxu0 }
 0x163   :  { %v2105_v42 = vadd.f32 %v2104_v41, %v2103_v38  ;;  %v2216_v48 = vpop.f32.mrb[37].mxu1  ;;  %v2106_v25 = vpop.f32.mrb[38].mxu0  ;;  %v702_v38 = vld [vmem:[#allocation2 + $0xc0] sm:$0xff] }
 0x164   :  { %1337 = vst [vmem:[#allocation2 + $0x88] sm:$0xff] %v1305_v39  ;;  %v2217_v49 = vadd.f32 %v2216_v48, %v2215_v40  ;;  %v2218_v50 = vpop.f32.mrb[38].mxu1  ;;  %v2107_v51 = vpop.f32.mrb[39].mxu0  ;;  %v703_v48 = vld [vmem:[#allocation2 + $0xc8] sm:$0xff] }
 0x165   :  { %v2108_v53 = vadd.f32 %v2107_v51, %v2106_v25  ;;  %v2219_v54 = vpop.f32.mrb[39].mxu1 }
 0x166   :  { %v1234_v55 = vadd.f32 %v2217_v49, %v2105_v42  ;;  %v2220_v56 = vadd.f32 %v2219_v54, %v2218_v50 }
 0x168   :  { %v1306_v58 = vadd.f32 %v1234_v55, %v696_v52  ;;  %v1237_v59 = vadd.f32 %v2220_v56, %v2108_v53 }
 0x169   :  { %v2109_v60 = vpop.f32.mrb[40].mxu0 }
 0x16a   :  { %1338 = vst [vmem:[#allocation2 + $0x90] sm:$0xff] %v1306_v58  ;;  %v1307_v61 = vadd.f32 %v1237_v59, %v697_v57  ;;  %v2221_v62 = vpop.f32.mrb[40].mxu1  ;;  %v2110_v63 = vpop.f32.mrb[41].mxu0 }
 0x16b   :  { %v2111_v0 = vadd.f32 %v2110_v63, %v2109_v60  ;;  %v2222_v1 = vpop.f32.mrb[41].mxu1  ;;  %v2112_v2 = vpop.f32.mrb[42].mxu0  ;;  %v704_v60 = vld [vmem:[#allocation2 + $0xd0] sm:$0xff] }
 0x16c   :  { %1339 = vst [vmem:[#allocation2 + $0x98] sm:$0xff] %v1307_v61  ;;  %v2223_v3 = vadd.f32 %v2222_v1, %v2221_v62  ;;  %v2224_v4 = vpop.f32.mrb[42].mxu1  ;;  %v2113_v5 = vpop.f32.mrb[43].mxu0  ;;  %v705_v1 = vld [vmem:[#allocation2 + $0xd8] sm:$0xff] }
 0x16d   :  { %v2114_v6 = vadd.f32 %v2113_v5, %v2112_v2  ;;  %v2225_v44 = vpop.f32.mrb[43].mxu1 }
 0x16e   :  { %v1242_v45 = vadd.f32 %v2223_v3, %v2111_v0  ;;  %v2226_v46 = vadd.f32 %v2225_v44, %v2224_v4 }
 0x170   :  { %v1308_v8 = vadd.f32 %v1242_v45, %v698_v43  ;;  %v1245_v9 = vadd.f32 %v2226_v46, %v2114_v6 }
 0x171   :  { %v2115_v10 = vpop.f32.mrb[44].mxu0 }
 0x172   :  { %1340 = vst [vmem:[#allocation2 + $0xa0] sm:$0xff] %v1308_v8  ;;  %v1309_v11 = vadd.f32 %v1245_v9, %v699_v7  ;;  %v2227_v12 = vpop.f32.mrb[44].mxu1  ;;  %v2116_v13 = vpop.f32.mrb[45].mxu0 }
 0x173   :  { %v2117_v14 = vadd.f32 %v2116_v13, %v2115_v10  ;;  %v2228_v15 = vpop.f32.mrb[45].mxu1  ;;  %v2118_v16 = vpop.f32.mrb[46].mxu0  ;;  %v706_v10 = vld [vmem:[#allocation2 + $0xe0] sm:$0xff] }
 0x174   :  { %1341 = vst [vmem:[#allocation2 + $0xa8] sm:$0xff] %v1309_v11  ;;  %v2229_v17 = vadd.f32 %v2228_v15, %v2227_v12  ;;  %v2230_v18 = vpop.f32.mrb[46].mxu1  ;;  %v2119_v19 = vpop.f32.mrb[47].mxu0  ;;  %v707_v15 = vld [vmem:[#allocation2 + $0xe8] sm:$0xff] }
 0x175   :  { %v2120_v21 = vadd.f32 %v2119_v19, %v2118_v16  ;;  %v2231_v22 = vpop.f32.mrb[47].mxu1 }
 0x176   :  { %v1250_v47 = vadd.f32 %v2229_v17, %v2117_v14  ;;  %v2232_v23 = vadd.f32 %v2231_v22, %v2230_v18 }
 0x178   :  { %v1310_v26 = vadd.f32 %v1250_v47, %v700_v20  ;;  %v1253_v27 = vadd.f32 %v2232_v23, %v2120_v21 }
 0x179   :  { %v2121_v28 = vpop.f32.mrb[48].mxu0 }
 0x17a   :  { %1342 = vst [vmem:[#allocation2 + $0xb0] sm:$0xff] %v1310_v26  ;;  %v1311_v29 = vadd.f32 %v1253_v27, %v701_v24  ;;  %v2233_v30 = vpop.f32.mrb[48].mxu1  ;;  %v2122_v31 = vpop.f32.mrb[49].mxu0 }
 0x17b   :  { %v2123_v32 = vadd.f32 %v2122_v31, %v2121_v28  ;;  %v2234_v33 = vpop.f32.mrb[49].mxu1  ;;  %v2124_v34 = vpop.f32.mrb[50].mxu0  ;;  %v708_v28 = vld [vmem:[#allocation2 + $0xf0] sm:$0xff] }
 0x17c   :  { %1343 = vst [vmem:[#allocation2 + $0xb8] sm:$0xff] %v1311_v29  ;;  %v2235_v35 = vadd.f32 %v2234_v33, %v2233_v30  ;;  %v2236_v36 = vpop.f32.mrb[50].mxu1  ;;  %v2125_v37 = vpop.f32.mrb[51].mxu0  ;;  %v709_v33 = vld [vmem:[#allocation2 + $0xf8] sm:$0xff] }
 0x17d   :  { %v2126_v39 = vadd.f32 %v2125_v37, %v2124_v34  ;;  %v2237_v40 = vpop.f32.mrb[51].mxu1 }
 0x17e   :  { %v1258_v41 = vadd.f32 %v2235_v35, %v2123_v32  ;;  %v2238_v42 = vadd.f32 %v2237_v40, %v2236_v36 }
 0x180   :  { %v1312_v25 = vadd.f32 %v1258_v41, %v702_v38  ;;  %v1261_v49 = vadd.f32 %v2238_v42, %v2126_v39 }
 0x181   :  { %v2127_v50 = vpop.f32.mrb[52].mxu0 }
 0x182   :  { %1344 = vst [vmem:[#allocation2 + $0xc0] sm:$0xff] %v1312_v25  ;;  %v1313_v51 = vadd.f32 %v1261_v49, %v703_v48  ;;  %v2239_v52 = vpop.f32.mrb[52].mxu1  ;;  %v2128_v53 = vpop.f32.mrb[53].mxu0 }
 0x183   :  { %v2129_v54 = vadd.f32 %v2128_v53, %v2127_v50  ;;  %v2240_v55 = vpop.f32.mrb[53].mxu1  ;;  %v2130_v56 = vpop.f32.mrb[54].mxu0 }
 0x184   :  { %1345 = vst [vmem:[#allocation2 + $0xc8] sm:$0xff] %v1313_v51  ;;  %v2241_v57 = vadd.f32 %v2240_v55, %v2239_v52  ;;  %v2242_v58 = vpop.f32.mrb[54].mxu1  ;;  %v2131_v59 = vpop.f32.mrb[55].mxu0 }
 0x185   :  { %v2132_v61 = vadd.f32 %v2131_v59, %v2130_v56  ;;  %v2243_v62 = vpop.f32.mrb[55].mxu1 }
 0x186   :  { %v1266_v63 = vadd.f32 %v2241_v57, %v2129_v54  ;;  %v2244_v0 = vadd.f32 %v2243_v62, %v2242_v58 }
 0x188   :  { %v1314_v2 = vadd.f32 %v1266_v63, %v704_v60  ;;  %v1269_v3 = vadd.f32 %v2244_v0, %v2132_v61 }
 0x189   :  { %v2133_v4 = vpop.f32.mrb[56].mxu0 }
 0x18a   :  { %1346 = vst [vmem:[#allocation2 + $0xd0] sm:$0xff] %v1314_v2  ;;  %v1315_v5 = vadd.f32 %v1269_v3, %v705_v1  ;;  %v2245_v43 = vpop.f32.mrb[56].mxu1  ;;  %v2134_v6 = vpop.f32.mrb[57].mxu0 }
 0x18b   :  { %v2135_v44 = vadd.f32 %v2134_v6, %v2133_v4  ;;  %v2246_v45 = vpop.f32.mrb[57].mxu1  ;;  %v2136_v46 = vpop.f32.mrb[58].mxu0 }
 0x18c   :  { %1347 = vst [vmem:[#allocation2 + $0xd8] sm:$0xff] %v1315_v5  ;;  %v2247_v7 = vadd.f32 %v2246_v45, %v2245_v43  ;;  %v2248_v8 = vpop.f32.mrb[58].mxu1  ;;  %v2137_v9 = vpop.f32.mrb[59].mxu0 }
 0x18d   :  { %v2138_v11 = vadd.f32 %v2137_v9, %v2136_v46  ;;  %v2249_v12 = vpop.f32.mrb[59].mxu1 }
 0x18e   :  { %v1274_v13 = vadd.f32 %v2247_v7, %v2135_v44  ;;  %v2250_v14 = vadd.f32 %v2249_v12, %v2248_v8 }
 0x190   :  { %v1316_v16 = vadd.f32 %v1274_v13, %v706_v10  ;;  %v1277_v17 = vadd.f32 %v2250_v14, %v2138_v11 }
 0x191   :  { %v2139_v18 = vpop.f32.mrb[60].mxu0 }
 0x192   :  { %1348 = vst [vmem:[#allocation2 + $0xe0] sm:$0xff] %v1316_v16  ;;  %v1317_v19 = vadd.f32 %v1277_v17, %v707_v15  ;;  %v2251_v20 = vpop.f32.mrb[60].mxu1  ;;  %v2140_v21 = vpop.f32.mrb[61].mxu0 }
 0x193   :  { %v2141_v22 = vadd.f32 %v2140_v21, %v2139_v18  ;;  %v2252_v47 = vpop.f32.mrb[61].mxu1  ;;  %v2142_v23 = vpop.f32.mrb[62].mxu0 }
 0x194   :  { %1349 = vst [vmem:[#allocation2 + $0xe8] sm:$0xff] %v1317_v19  ;;  %v2253_v24 = vadd.f32 %v2252_v47, %v2251_v20  ;;  %v2254_v26 = vpop.f32.mrb[62].mxu1  ;;  %v2143_v27 = vpop.f32.mrb[63].mxu0 }
 0x195   :  { %v2144_v29 = vadd.f32 %v2143_v27, %v2142_v23  ;;  %v2255_v30 = vpop.f32.mrb[63].mxu1 }
 0x196   :  { %v1282_v31 = vadd.f32 %v2253_v24, %v2141_v22  ;;  %v2256_v32 = vadd.f32 %v2255_v30, %v2254_v26 }
 0x198   :  { %v1318_v34 = vadd.f32 %v1282_v31, %v708_v28  ;;  %v1285_v35 = vadd.f32 %v2256_v32, %v2144_v29 }
 0x19a   :  { %1350 = vst [vmem:[#allocation2 + $0xf0] sm:$0xff] %v1318_v34  ;;  %v1319_v36 = vadd.f32 %v1285_v35, %v709_v33 }
 0x19c   :  { %1351 = vst [vmem:[#allocation2 + $0xf8] sm:$0xff] %v1319_v36 }
 0x19d PF:  { %v1355_v37 = vld [vmem:[#allocation2] sm:$0xff]  ;;  %v1356_v38 = vld [vmem:[#allocation2 + $0x8] sm:$0xff]  ;;  %v1357_v39 = vld [vmem:[#allocation2 + $0x10] sm:$0xff]  ;;  %s2350_s2 = smov [#allocation9]  }
 0x19e   :  { %v1941_v40 = vpack.c.bf16 %v1356_v38, %v1355_v37  ;;  %v1358_v41 = vld [vmem:[#allocation2 + $0x18] sm:$0xff]  ;;  %v1359_v42 = vld [vmem:[#allocation2 + $0x20] sm:$0xff]  ;;  %v1360_v48 = vld [vmem:[#allocation2 + $0x28] sm:$0xff]  ;;  %s1552_s16 = sshll.u32 %s2350_s2, 4  ;;  %s1553_s16 = int_to_ptr.vmem [resolvable:$true] %s1552_s16 }
 0x19f   :  { %v1946_v25 = vpack.c.bf16 %v1358_v41, %v1357_v39  ;;  %v1951_v49 = vpack.c.bf16 %v1360_v48, %v1359_v42  ;;  %v1361_v50 = vld [vmem:[#allocation2 + $0x30] sm:$0xff]  ;;  %v1362_v51 = vld [vmem:[#allocation2 + $0x38] sm:$0xff]  ;;  %v1363_v52 = vld [vmem:[#allocation2 + $0x40] sm:$0xff]  ;;  %s2319_s17 = scalar_lea.vmem %s1553_s16, 2048  ;;  %p2324_p2 = scmp.lt.s32.totalorder %s1553_s16, %s1553_s16 }
 0x1a0   :  { %1942 = vst [vmem:[#allocation9] sm:$0xff] %v1941_v40   ;;  %v1956_v53 = vpack.c.bf16 %v1362_v51, %v1361_v50  ;;  %v1364_v54 = vld [vmem:[#allocation2 + $0x48] sm:$0xff]  ;;  %v1365_v55 = vld [vmem:[#allocation2 + $0x50] sm:$0xff]  ;;  %v1366_v56 = vld [vmem:[#allocation2 + $0x58] sm:$0xff]  ;;  %p2320_p1 = scmp.ne.s32.totalorder %s1553_s16, %s2319_s17  ;;  %p2325_p3 = scmp.lt.s32.totalorder %s2319_s17, %s2319_s17 }
 0x1a1   :  { %2018 = vst [vmem:[#allocation9 + $0x8] sm:$0xff] %v1946_v25   ;;  %2019 = vst [vmem:[#allocation9 + $0x10] sm:$0xff] %v1951_v49   ;;  %v1961_v57 = vpack.c.bf16 %v1364_v54, %v1363_v52  ;;  %v1966_v58 = vpack.c.bf16 %v1366_v56, %v1365_v55  ;;  %v1367_v59 = vld [vmem:[#allocation2 + $0x60] sm:$0xff]  ;;  %v1368_v60 = vld [vmem:[#allocation2 + $0x68] sm:$0xff] }
 0x1a2   :  { %v1369_v61 = vld [vmem:[#allocation2 + $0x70] sm:$0xff]  ;;  %2020 = vst [vmem:[#allocation9 + $0x18] sm:$0xff] %v1956_v53   ;;  %v1971_v62 = vpack.c.bf16 %v1368_v60, %v1367_v59  ;;  %v1370_v63 = vld [vmem:[#allocation2 + $0x78] sm:$0xff]  ;;  %v1371_v0 = vld [vmem:[#allocation2 + $0x80] sm:$0xff]  ;;  %p2326_p4 = por %p2325_p3, %p2324_p2 }
 0x1a3   :  { %v1372_v1 = vld [vmem:[#allocation2 + $0x88] sm:$0xff]  ;;  %2021 = vst [vmem:[#allocation9 + $0x20] sm:$0xff] %v1961_v57   ;;  %2022 = vst [vmem:[#allocation9 + $0x28] sm:$0xff] %v1966_v58   ;;  %v1976_v2 = vpack.c.bf16 %v1370_v63, %v1369_v61  ;;  %v1373_v4 = vld [vmem:[#allocation2 + $0x90] sm:$0xff] }
 0x1a4   :  { %v1981_v3 = vpack.c.bf16 %v1372_v1, %v1371_v0  ;;  %v1374_v5 = vld [vmem:[#allocation2 + $0x98] sm:$0xff]  ;;  %v1375_v43 = vld [vmem:[#allocation2 + $0xa0] sm:$0xff]  ;;  %2023 = vst [vmem:[#allocation9 + $0x30] sm:$0xff] %v1971_v62   ;;  %v1376_v44 = vld [vmem:[#allocation2 + $0xa8] sm:$0xff]  ;;  %p2327_p5 = pnand %p2326_p4, %p2320_p1 }
 0x1a5   :  { %v1986_v6 = vpack.c.bf16 %v1374_v5, %v1373_v4  ;;  %v1377_v45 = vld [vmem:[#allocation2 + $0xb0] sm:$0xff]  ;;  %v1378_v46 = vld [vmem:[#allocation2 + $0xb8] sm:$0xff]  ;;  %2024 = vst [vmem:[#allocation9 + $0x38] sm:$0xff] %v1976_v2   ;;  %v1991_v7 = vpack.c.bf16 %v1376_v44, %v1375_v43  ;;  %v1379_v9 = vld [vmem:[#allocation2 + $0xc0] sm:$0xff] }
 0x1a6   :  { %2025 = vst [vmem:[#allocation9 + $0x40] sm:$0xff] %v1981_v3   ;;  %v1996_v8 = vpack.c.bf16 %v1378_v46, %v1377_v45  ;;  %v1380_v10 = vld [vmem:[#allocation2 + $0xc8] sm:$0xff]  ;;  %v1381_v11 = vld [vmem:[#allocation2 + $0xd0] sm:$0xff]  ;;  %v1382_v13 = vld [vmem:[#allocation2 + $0xd8] sm:$0xff] }
 0x1a7   :  { %2026 = vst [vmem:[#allocation9 + $0x48] sm:$0xff] %v1986_v6   ;;  %v2001_v12 = vpack.c.bf16 %v1380_v10, %v1379_v9  ;;  %v1383_v14 = vld [vmem:[#allocation2 + $0xe0] sm:$0xff]  ;;  %v1384_v15 = vld [vmem:[#allocation2 + $0xe8] sm:$0xff]  ;;  %2027 = vst [vmem:[#allocation9 + $0x50] sm:$0xff] %v1991_v7   ;;  %v2006_v16 = vpack.c.bf16 %v1382_v13, %v1381_v11 }
 0x1a8   :  { %2028 = vst [vmem:[#allocation9 + $0x58] sm:$0xff] %v1996_v8   ;;  %v2011_v17 = vpack.c.bf16 %v1384_v15, %v1383_v14  ;;  %v1385_v18 = vld [vmem:[#allocation2 + $0xf0] sm:$0xff]  ;;  %v1386_v19 = vld [vmem:[#allocation2 + $0xf8] sm:$0xff] }
 0x1a9   :  { %2029 = vst [vmem:[#allocation9 + $0x60] sm:$0xff] %v2001_v12   ;;  %v2016_v20 = vpack.c.bf16 %v1386_v19, %v1385_v18  ;;  %2030 = vst [vmem:[#allocation9 + $0x68] sm:$0xff] %v2006_v16  }
 0x1aa   :  { %2031 = vst [vmem:[#allocation9 + $0x70] sm:$0xff] %v2011_v17  }
 0x1ab   :  { %2032 = vst [vmem:[#allocation9 + $0x78] sm:$0xff] %v2016_v20  }
 0x1ac   :  { %2330 = shalt.err (!%p2327_p5)
}
 0x1ad   :  { %s2331_s20 = scalar_lea.hbm %s3387_s4, 2048 }
 0x1ae   :  { %p2332_p6 = scmp.ne.s32.totalorder %s3387_s4, %s2331_s20  ;;  %p2335_p7 = scmp.lt.u32.totalorder %s2331_s20, %s3387_s4 }
 0x1b0   :  { %p2337_p8 = pnand %p2335_p7, %p2332_p6 }
 0x1b2   :  { %2340 = shalt.err (!%p2337_p8)
}
 0x1b3   :  { %1558 = dma.vmem_to_hbm [thread:$0]  %s1553_s16, 2048, %s3387_s4, [#allocation8], %s2346_s7, %s2346_s7, %s2347_s8  }
 0x1b4   :  { %2343 = dma.done.wait [#allocation8], 2048  }
 0x1b5   :  { %2344 = vsyncadd [#allocation8], 4294965248 }
 0x1b6   :  { %1562 = vsyncpa [#allocation7], 1 }
 0x1b7   :  { %1563 = vsyncpa [#allocation8], 1 }

</bundles_post_ra>
